<compile_context>
chip_gen: v7x
topology: tpu7x:2x2x1
jax: 0.10.0
libtpu: 0.0.40
codegen_flags: <defaults>
</compile_context>

<pallas_src>
import numpy as np
import jax
import jax.numpy as jnp
from jax import lax
from jax.experimental import pallas as pl
from jax.experimental.pallas import tpu as pltpu


# ----------------------------------------------------------------------------
# Fused kernel: all TemporalBlocks in one body, activations stay in registers.
# ----------------------------------------------------------------------------
def make_tcn_kernel(cfgs, bblk, S, m0, L, Wtot, mxu_dtype):
    """cfgs: per-layer dicts with K, dilation, relu, has_down.

    Layout: (C, Wtot) slab; sample s occupies lanes [s*S, (s+1)*S) with
    m0 zero "causal history" lanes followed by L signal lanes.  Offsets are
    stationary across layers (margins are re-zeroed with one hoisted mask)."""

    def kernel(*refs):
        # Unpack refs: input, then per-layer weights, then output.
        idx = 0
        x_ref = refs[idx]; idx += 1
        layer_refs = []
        for cfg in cfgs:
            n = 6 if cfg["has_down"] else 4
            layer_refs.append(refs[idx:idx + n])
            idx += n
        out_ref = refs[idx]

        # -------- hoisted constants: ONE (1, Wtot) mask row for all convs ----
        col = lax.broadcasted_iota(jnp.int32, (1, Wtot), 1)
        valid = col < 0                                   # all-False start
        for s in range(bblk):
            valid = valid | ((col >= s * S + m0) & (col < (s + 1) * S))
        mask = valid.astype(jnp.float32)                  # 1=signal, 0=margin/pad

        # -------- build the lane-packed slab in registers (no host pad) ------
        xb = x_ref[...].astype(jnp.float32)               # (bblk, C0, L)
        C0 = xb.shape[1]
        pieces = []
        zero_m = jnp.zeros((C0, m0), jnp.float32) if m0 > 0 else None
        for s in range(bblk):
            if m0 > 0:
                pieces.append(zero_m)
            pieces.append(xb[s])
        tail = Wtot - bblk * S
        if tail > 0:
            pieces.append(jnp.zeros((C0, tail), jnp.float32))
        act = jnp.concatenate(pieces, axis=1) if len(pieces) > 1 else pieces[0]

        def shift_right(a, s):
            """a[:, j] -> a[:, j - s], zero-filled on the left (static s)."""
            if s == 0:
                return a
            z = jnp.zeros((a.shape[0], s), a.dtype)
            return jnp.concatenate([z, a[:, :Wtot - s]], axis=1)

        def conv(a, wf_ref, b_ref, K, d):
            """Causal dilated conv as ONE MXU dot: the K taps are folded into
            the contraction dim (stacked along sublanes).  Output (C_out, Wtot)
            in f32; margin columns are NOT yet re-zeroed."""
            a_mx = a.astype(mxu_dtype)                    # bf16 path: cast once
            taps = [shift_right(a_mx, (K - 1 - k) * d) for k in range(K)]
            stacked = jnp.concatenate(taps, axis=0) if K > 1 else taps[0]
            acc = jnp.dot(wf_ref[...], stacked,
                          preferred_element_type=jnp.float32)
            return acc + b_ref[...]                       # bias/elementwise in f32

        for cfg, wrefs in zip(cfgs, layer_refs):
            K, d, relu = cfg["K"], cfg["dilation"], cfg["relu"]
            if cfg["has_down"]:
                w1, b1, w2, b2, wd, bd = wrefs
            else:
                w1, b1, w2, b2 = wrefs

            # conv1 -> chomp -> [relu] -> dropout(=identity)
            h = conv(act, w1, b1, K, d) * mask            # margin exactly zero
            if relu:
                h = jnp.maximum(h, 0.0)
            # TODO(synk): training-mode dropout would use pltpu.prng_random_bits.

            # conv2 -> chomp -> [relu] -> dropout(=identity)
            out = conv(h, w2, b2, K, d)
            if relu:
                out = jnp.maximum(out, 0.0)

            # residual path (stationary layout: no re-slicing / re-alignment)
            if cfg["has_down"]:
                res = jnp.dot(wd[...], act.astype(mxu_dtype),
                              preferred_element_type=jnp.float32) + bd[...]
            else:
                res = act

            act = out + res
            if relu:
                act = jnp.maximum(act, 0.0)
            act = act * mask                              # keep margins exactly 0

        # -------- unpack the per-sample signal windows into the output -------
        for s in range(bblk):
            start = s * S + m0
            out_ref[s] = act[:, start:start + L].astype(out_ref.dtype)

    return kernel


# ----------------------------------------------------------------------------
# Wrapper: single pallas_call for the whole network.
# ----------------------------------------------------------------------------
def temporal_conv_net(x, layers, *, bblk=2, mxu_dtype=jnp.float32):
    """Full TemporalConvNet forward (last block has no ReLUs)."""
    B, C0, L = x.shape
    n = len(layers)
    if bblk < 1 or B % bblk != 0:
        bblk = 1

    # Per-sample causal-history margin = max single-conv look-back in the net.
    m0 = max((l["K"] - 1) * l["dilation"] for l in layers)
    S = m0 + L                                            # per-sample lane slot
    Wtot = max(128, ((bblk * S + 127) // 128) * 128)      # lane-dense width

    args = [x]
    in_specs = [pl.BlockSpec((bblk, C0, L), lambda g: (g, 0, 0))]
    cfgs = []
    for i, l in enumerate(layers):
        p = l["params"]
        K, C_in, C_out = l["K"], l["C_in"], l["C_out"]
        cfgs.append(dict(K=K, dilation=l["dilation"],
                         relu=(i != n - 1), has_down=l["has_down"]))
        args += [p["w1_fold"].astype(mxu_dtype), p["b1"],
                 p["w2_fold"].astype(mxu_dtype), p["b2"]]
        in_specs += [
            pl.BlockSpec((C_out, K * C_in), lambda g: (0, 0)),
            pl.BlockSpec((C_out, 1), lambda g: (0, 0)),
            pl.BlockSpec((C_out, K * C_out), lambda g: (0, 0)),
            pl.BlockSpec((C_out, 1), lambda g: (0, 0)),
        ]
        if l["has_down"]:
            args += [p["wd"].astype(mxu_dtype), p["bd"]]
            in_specs += [pl.BlockSpec((C_out, C_in), lambda g: (0, 0)),
                         pl.BlockSpec((C_out, 1), lambda g: (0, 0))]

    C_last = layers[-1]["C_out"]
    return pl.pallas_call(
        make_tcn_kernel(cfgs, bblk, S, m0, L, Wtot, mxu_dtype),
        out_shape=jax.ShapeDtypeStruct((B, C_last, L), jnp.float32),
        grid_spec=pltpu.PrefetchScalarGridSpec(
            num_scalar_prefetch=0,
            grid=(B // bblk,),
            in_specs=in_specs,
            out_specs=pl.BlockSpec((bblk, C_last, L), lambda g: (g, 0, 0)),
        ),
        compiler_params=pltpu.CompilerParams(
            dimension_semantics=("parallel",),
            # Weights have constant index maps; raising the scoped VMEM limit
            # keeps headroom for their (default) double-buffering at realistic
            # channel counts.  (pipeline_mode=pl.Buffered(1) on the weight
            # specs is the stronger fix where that kwarg is available.)
            vmem_limit_bytes=64 * 1024 * 1024,
        ),
    )(*args)


# ----------------------------------------------------------------------------
# Deterministic parameter init (mirrors TemporalBlock.init_weights), with
# MXU-ready folded (C_out, K*C_in) weight layouts computed once here.
# ----------------------------------------------------------------------------
def init_params(key, num_inputs, num_channels, K):
    layers = []
    keys = jax.random.split(key, len(num_channels))
    for i, C_out in enumerate(num_channels):
        C_in = num_inputs if i == 0 else num_channels[i - 1]
        k1, k2, k3, k4, k5, k6 = jax.random.split(keys[i], 6)

        # conv1: normal(std=0.001), then weight[:, 0, :] += 1/K
        w1 = 0.001 * jax.random.normal(k1, (C_out, C_in, K), jnp.float32)
        w1 = w1.at[:, 0, :].add(1.0 / K)
        b1 = 1e-6 * jax.random.normal(k2, (C_out,), jnp.float32)

        # conv2: normal(std=0.001), then whole weight += 1/K
        w2 = 0.001 * jax.random.normal(k3, (C_out, C_out, K), jnp.float32) + 1.0 / K
        b2 = 1e-6 * jax.random.normal(k4, (C_out,), jnp.float32)
        # weight_norm(dim=0) with g = ||v|| is the identity at init.

        p = {
            "w1_oik": w1, "b1": b1[:, None],
            "w2_oik": w2, "b2": b2[:, None],
            # Folded, MXU-ready layouts: [o, k*C_in + c] = w[o, c, k].
            "w1_fold": jnp.transpose(w1, (0, 2, 1)).reshape(C_out, K * C_in),
            "w2_fold": jnp.transpose(w2, (0, 2, 1)).reshape(C_out, K * C_out),
        }
        has_down = C_in != C_out
        if has_down:
            wd = 0.1 * jax.random.normal(k5, (C_out, C_in), jnp.float32)
            bound = 1.0 / np.sqrt(C_in)
            bd = jax.random.uniform(k6, (C_out,), jnp.float32, -bound, bound)
            p["wd"] = wd
            p["bd"] = bd[:, None]

        layers.append({"params": p, "K": K, "dilation": 2 ** i,
                       "C_in": C_in, "C_out": C_out, "has_down": has_down})
    return layers


# ----------------------------------------------------------------------------
# Pure-JAX reference (correctness check).
# ----------------------------------------------------------------------------
def ref_block(x, p, K, dilation, relu_flag):
    pad = (K - 1) * dilation
    dn = ("NCH", "OIH", "NCH")
    h = lax.conv_general_dilated(x, p["w1_oik"], (1,), [(pad, 0)],
                                 rhs_dilation=(dilation,),
                                 dimension_numbers=dn) + p["b1"][None]
    if relu_flag:
        h = jnp.maximum(h, 0.0)
    out = lax.conv_general_dilated(h, p["w2_oik"], (1,), [(pad, 0)],
                                   rhs_dilation=(dilation,),
                                   dimension_numbers=dn) + p["b2"][None]
    if relu_flag:
        out = jnp.maximum(out, 0.0)
    if "wd" in p:
        res = jnp.einsum("oc,bcl->bol", p["wd"], x) + p["bd"][None]
    else:
        res = x
    y = out + res
    if relu_flag:
        y = jnp.maximum(y, 0.0)
    return y


def ref_net(x, layers):
    n = len(layers)
    for i, l in enumerate(layers):
        x = ref_block(x, l["params"], l["K"], l["dilation"], i != n - 1)
    return x


# ----------------------------------------------------------------------------
if __name__ == "__main__":
    B, num_inputs, L = 4, 4, 16
    num_channels = [8, 8, 6]     # last level is TemporalBlock_last (no ReLUs)
    K = 2

    key = jax.random.PRNGKey(0)
    kx, kp = jax.random.split(key)
    x = jax.random.normal(kx, (B, num_inputs, L), jnp.float32)
    layers = init_params(kp, num_inputs, num_channels, K)

    # f32 MXU path (default): tight check against the conv reference.
    y = jax.block_until_ready(temporal_conv_net(x, layers, bblk=2))
    y_ref = jax.block_until_ready(ref_net(x, layers))
    np.testing.assert_allclose(np.asarray(y), np.asarray(y_ref),
                               rtol=1e-4, atol=1e-5)
    assert y.shape == (B, num_channels[-1], L)

    # Optional bf16 MXU-operand path (v6e/v7x feedback): loose, norm-based check.
    y_bf = jax.block_until_ready(
        temporal_conv_net(x, layers, bblk=2, mxu_dtype=jnp.bfloat16))
    rel = (np.linalg.norm(np.asarray(y_bf) - np.asarray(y_ref))
           / np.linalg.norm(np.asarray(y_ref)))
    assert rel < 5e-2, f"bf16 path relative error too large: {rel}"

    print("KERNEL_OK")
</pallas_src>

<mosaic_0001>
module attributes {stable_mosaic.version = 11 : i64} {
  func.func @kernel(%arg0: i32, %arg1: memref<2x4x16xf32, #tpu.memory_space<vmem>>, %arg2: memref<8x8xf32, #tpu.memory_space<vmem>>, %arg3: memref<8x1xf32, #tpu.memory_space<vmem>>, %arg4: memref<8x16xf32, #tpu.memory_space<vmem>>, %arg5: memref<8x1xf32, #tpu.memory_space<vmem>>, %arg6: memref<8x4xf32, #tpu.memory_space<vmem>>, %arg7: memref<8x1xf32, #tpu.memory_space<vmem>>, %arg8: memref<8x16xf32, #tpu.memory_space<vmem>>, %arg9: memref<8x1xf32, #tpu.memory_space<vmem>>, %arg10: memref<8x16xf32, #tpu.memory_space<vmem>>, %arg11: memref<8x1xf32, #tpu.memory_space<vmem>>, %arg12: memref<6x16xf32, #tpu.memory_space<vmem>>, %arg13: memref<6x1xf32, #tpu.memory_space<vmem>>, %arg14: memref<6x12xf32, #tpu.memory_space<vmem>>, %arg15: memref<6x1xf32, #tpu.memory_space<vmem>>, %arg16: memref<6x8xf32, #tpu.memory_space<vmem>>, %arg17: memref<6x1xf32, #tpu.memory_space<vmem>>, %arg18: memref<2x6x16xf32, #tpu.memory_space<vmem>>) attributes {dimension_semantics = [#tpu.dimension_semantics<parallel>], iteration_bounds = array<i64: 2>, scalar_prefetch = 0 : i64, scratch_operands = 0 : i64, tpu.core_type = #tpu.core_type<tc>, window_params = [{transform_indices = @transform_0, window_bounds = array<i64: 2, 4, 16>}, {pipeline_mode = #tpu.pipeline_mode<synchronous>, transform_indices = @transform_1, window_bounds = array<i64: 8, 8>}, {pipeline_mode = #tpu.pipeline_mode<synchronous>, transform_indices = @transform_2, window_bounds = array<i64: 8, 1>}, {pipeline_mode = #tpu.pipeline_mode<synchronous>, transform_indices = @transform_3, window_bounds = array<i64: 8, 16>}, {pipeline_mode = #tpu.pipeline_mode<synchronous>, transform_indices = @transform_4, window_bounds = array<i64: 8, 1>}, {pipeline_mode = #tpu.pipeline_mode<synchronous>, transform_indices = @transform_5, window_bounds = array<i64: 8, 4>}, {pipeline_mode = #tpu.pipeline_mode<synchronous>, transform_indices = @transform_6, window_bounds = array<i64: 8, 1>}, {pipeline_mode = #tpu.pipeline_mode<synchronous>, transform_indices = @transform_7, window_bounds = array<i64: 8, 16>}, {pipeline_mode = #tpu.pipeline_mode<synchronous>, transform_indices = @transform_8, window_bounds = array<i64: 8, 1>}, {pipeline_mode = #tpu.pipeline_mode<synchronous>, transform_indices = @transform_9, window_bounds = array<i64: 8, 16>}, {pipeline_mode = #tpu.pipeline_mode<synchronous>, transform_indices = @transform_10, window_bounds = array<i64: 8, 1>}, {pipeline_mode = #tpu.pipeline_mode<synchronous>, transform_indices = @transform_11, window_bounds = array<i64: 6, 16>}, {pipeline_mode = #tpu.pipeline_mode<synchronous>, transform_indices = @transform_12, window_bounds = array<i64: 6, 1>}, {pipeline_mode = #tpu.pipeline_mode<synchronous>, transform_indices = @transform_13, window_bounds = array<i64: 6, 12>}, {pipeline_mode = #tpu.pipeline_mode<synchronous>, transform_indices = @transform_14, window_bounds = array<i64: 6, 1>}, {pipeline_mode = #tpu.pipeline_mode<synchronous>, transform_indices = @transform_15, window_bounds = array<i64: 6, 8>}, {pipeline_mode = #tpu.pipeline_mode<synchronous>, transform_indices = @transform_16, window_bounds = array<i64: 6, 1>}, {transform_indices = @transform_17, window_bounds = array<i64: 2, 6, 16>}]} {
    %0 = tpu.iota {dimensions = array<i32: 1>} : vector<1x128xi32>
    %c0_i32 = arith.constant 0 : i32
    %1 = vector.broadcast %c0_i32 : i32 to vector<1x128xi32>
    %2 = arith.cmpi slt, %0, %1 : vector<1x128xi32>
    %c4_i32 = arith.constant 4 : i32
    %3 = vector.broadcast %c4_i32 : i32 to vector<1x128xi32>
    %4 = arith.cmpi sge, %0, %3 : vector<1x128xi32>
    %c20_i32 = arith.constant 20 : i32
    %5 = vector.broadcast %c20_i32 : i32 to vector<1x128xi32>
    %6 = arith.cmpi slt, %0, %5 : vector<1x128xi32>
    %7 = arith.andi %4, %6 : vector<1x128xi1>
    %8 = arith.ori %2, %7 : vector<1x128xi1>
    %c24_i32 = arith.constant 24 : i32
    %9 = vector.broadcast %c24_i32 : i32 to vector<1x128xi32>
    %10 = arith.cmpi sge, %0, %9 : vector<1x128xi32>
    %c40_i32 = arith.constant 40 : i32
    %11 = vector.broadcast %c40_i32 : i32 to vector<1x128xi32>
    %12 = arith.cmpi slt, %0, %11 : vector<1x128xi32>
    %13 = arith.andi %10, %12 : vector<1x128xi1>
    %14 = arith.ori %8, %13 : vector<1x128xi1>
    %15 = arith.extui %14 : vector<1x128xi1> to vector<1x128xi32>
    %16 = arith.sitofp %15 : vector<1x128xi32> to vector<1x128xf32>
    %c0 = arith.constant 0 : index
    %c0_0 = arith.constant 0 : index
    %c0_1 = arith.constant 0 : index
    %17 = vector.load %arg1[%c0, %c0_0, %c0_1] : memref<2x4x16xf32, #tpu.memory_space<vmem>>, vector<2x4x16xf32>
    %cst = arith.constant 0.000000e+00 : f32
    %18 = vector.broadcast %cst : f32 to vector<4x4xf32>
    %19 = vector.extract_strided_slice %17 {offsets = [0, 0, 0], sizes = [1, 4, 16], strides = [1, 1, 1]} : vector<2x4x16xf32> to vector<1x4x16xf32>
    %20 = vector.shape_cast %19 : vector<1x4x16xf32> to vector<4x16xf32>
    %21 = vector.extract_strided_slice %17 {offsets = [1, 0, 0], sizes = [1, 4, 16], strides = [1, 1, 1]} : vector<2x4x16xf32> to vector<1x4x16xf32>
    %22 = vector.shape_cast %21 : vector<1x4x16xf32> to vector<4x16xf32>
    %cst_2 = arith.constant 0.000000e+00 : f32
    %23 = vector.broadcast %cst_2 : f32 to vector<4x88xf32>
    %24 = tpu.concatenate %18, %20, %18, %22, %23 in 1 : vector<4x4xf32>, vector<4x16xf32>, vector<4x4xf32>, vector<4x16xf32>, vector<4x88xf32> -> vector<4x128xf32>
    %cst_3 = arith.constant 0.000000e+00 : f32
    %25 = vector.broadcast %cst_3 : f32 to vector<4x1xf32>
    %26 = vector.extract_strided_slice %24 {offsets = [0, 0], sizes = [4, 127], strides = [1, 1]} : vector<4x128xf32> to vector<4x127xf32>
    %27 = tpu.concatenate %25, %26 in 1 : vector<4x1xf32>, vector<4x127xf32> -> vector<4x128xf32>
    %28 = tpu.concatenate %27, %24 in 0 : vector<4x128xf32>, vector<4x128xf32> -> vector<8x128xf32>
    %c0_4 = arith.constant 0 : index
    %c0_5 = arith.constant 0 : index
    %29 = vector.load %arg2[%c0_4, %c0_5] : memref<8x8xf32, #tpu.memory_space<vmem>>, vector<8x8xf32>
    %cst_6 = arith.constant dense<0.000000e+00> : vector<8x128xf32>
    %30 = tpu.matmul %29, %28, %cst_6 {dimension_numbers = #tpu.dot_dimension_numbers<[1], [0], [0], [1], [0, 0, 1, 1], [], []>} : vector<8x8xf32>, vector<8x128xf32>, vector<8x128xf32> -> vector<8x128xf32>
    %c0_7 = arith.constant 0 : index
    %c0_8 = arith.constant 0 : index
    %31 = vector.load %arg3[%c0_7, %c0_8] : memref<8x1xf32, #tpu.memory_space<vmem>>, vector<8x1xf32>
    %32 = vector.broadcast %31 : vector<8x1xf32> to vector<8x128xf32>
    %33 = arith.addf %30, %32 : vector<8x128xf32>
    %34 = vector.broadcast %16 : vector<1x128xf32> to vector<8x128xf32>
    %35 = arith.mulf %33, %34 : vector<8x128xf32>
    %cst_9 = arith.constant 0.000000e+00 : f32
    %36 = vector.broadcast %cst_9 : f32 to vector<8x128xf32>
    %37 = arith.maximumf %35, %36 : vector<8x128xf32>
    %cst_10 = arith.constant 0.000000e+00 : f32
    %38 = vector.broadcast %cst_10 : f32 to vector<8x1xf32>
    %39 = vector.extract_strided_slice %37 {offsets = [0, 0], sizes = [8, 127], strides = [1, 1]} : vector<8x128xf32> to vector<8x127xf32>
    %40 = tpu.concatenate %38, %39 in 1 : vector<8x1xf32>, vector<8x127xf32> -> vector<8x128xf32>
    %41 = tpu.concatenate %40, %37 in 0 : vector<8x128xf32>, vector<8x128xf32> -> vector<16x128xf32>
    %c0_11 = arith.constant 0 : index
    %c0_12 = arith.constant 0 : index
    %42 = vector.load %arg4[%c0_11, %c0_12] : memref<8x16xf32, #tpu.memory_space<vmem>>, vector<8x16xf32>
    %cst_13 = arith.constant dense<0.000000e+00> : vector<8x128xf32>
    %43 = tpu.matmul %42, %41, %cst_13 {dimension_numbers = #tpu.dot_dimension_numbers<[1], [0], [0], [1], [0, 0, 1, 1], [], []>} : vector<8x16xf32>, vector<16x128xf32>, vector<8x128xf32> -> vector<8x128xf32>
    %c0_14 = arith.constant 0 : index
    %c0_15 = arith.constant 0 : index
    %44 = vector.load %arg5[%c0_14, %c0_15] : memref<8x1xf32, #tpu.memory_space<vmem>>, vector<8x1xf32>
    %45 = vector.broadcast %44 : vector<8x1xf32> to vector<8x128xf32>
    %46 = arith.addf %43, %45 : vector<8x128xf32>
    %cst_16 = arith.constant 0.000000e+00 : f32
    %47 = vector.broadcast %cst_16 : f32 to vector<8x128xf32>
    %48 = arith.maximumf %46, %47 : vector<8x128xf32>
    %c0_17 = arith.constant 0 : index
    %c0_18 = arith.constant 0 : index
    %49 = vector.load %arg6[%c0_17, %c0_18] : memref<8x4xf32, #tpu.memory_space<vmem>>, vector<8x4xf32>
    %cst_19 = arith.constant dense<0.000000e+00> : vector<8x128xf32>
    %50 = tpu.matmul %49, %24, %cst_19 {dimension_numbers = #tpu.dot_dimension_numbers<[1], [0], [0], [1], [0, 0, 1, 1], [], []>} : vector<8x4xf32>, vector<4x128xf32>, vector<8x128xf32> -> vector<8x128xf32>
    %c0_20 = arith.constant 0 : index
    %c0_21 = arith.constant 0 : index
    %51 = vector.load %arg7[%c0_20, %c0_21] : memref<8x1xf32, #tpu.memory_space<vmem>>, vector<8x1xf32>
    %52 = vector.broadcast %51 : vector<8x1xf32> to vector<8x128xf32>
    %53 = arith.addf %50, %52 : vector<8x128xf32>
    %54 = arith.addf %48, %53 : vector<8x128xf32>
    %cst_22 = arith.constant 0.000000e+00 : f32
    %55 = vector.broadcast %cst_22 : f32 to vector<8x128xf32>
    %56 = arith.maximumf %54, %55 : vector<8x128xf32>
    %57 = vector.broadcast %16 : vector<1x128xf32> to vector<8x128xf32>
    %58 = arith.mulf %56, %57 : vector<8x128xf32>
    %cst_23 = arith.constant 0.000000e+00 : f32
    %59 = vector.broadcast %cst_23 : f32 to vector<8x2xf32>
    %60 = vector.extract_strided_slice %58 {offsets = [0, 0], sizes = [8, 126], strides = [1, 1]} : vector<8x128xf32> to vector<8x126xf32>
    %61 = tpu.concatenate %59, %60 in 1 : vector<8x2xf32>, vector<8x126xf32> -> vector<8x128xf32>
    %62 = tpu.concatenate %61, %58 in 0 : vector<8x128xf32>, vector<8x128xf32> -> vector<16x128xf32>
    %c0_24 = arith.constant 0 : index
    %c0_25 = arith.constant 0 : index
    %63 = vector.load %arg8[%c0_24, %c0_25] : memref<8x16xf32, #tpu.memory_space<vmem>>, vector<8x16xf32>
    %cst_26 = arith.constant dense<0.000000e+00> : vector<8x128xf32>
    %64 = tpu.matmul %63, %62, %cst_26 {dimension_numbers = #tpu.dot_dimension_numbers<[1], [0], [0], [1], [0, 0, 1, 1], [], []>} : vector<8x16xf32>, vector<16x128xf32>, vector<8x128xf32> -> vector<8x128xf32>
    %c0_27 = arith.constant 0 : index
    %c0_28 = arith.constant 0 : index
    %65 = vector.load %arg9[%c0_27, %c0_28] : memref<8x1xf32, #tpu.memory_space<vmem>>, vector<8x1xf32>
    %66 = vector.broadcast %65 : vector<8x1xf32> to vector<8x128xf32>
    %67 = arith.addf %64, %66 : vector<8x128xf32>
    %68 = vector.broadcast %16 : vector<1x128xf32> to vector<8x128xf32>
    %69 = arith.mulf %67, %68 : vector<8x128xf32>
    %cst_29 = arith.constant 0.000000e+00 : f32
    %70 = vector.broadcast %cst_29 : f32 to vector<8x128xf32>
    %71 = arith.maximumf %69, %70 : vector<8x128xf32>
    %cst_30 = arith.constant 0.000000e+00 : f32
    %72 = vector.broadcast %cst_30 : f32 to vector<8x2xf32>
    %73 = vector.extract_strided_slice %71 {offsets = [0, 0], sizes = [8, 126], strides = [1, 1]} : vector<8x128xf32> to vector<8x126xf32>
    %74 = tpu.concatenate %72, %73 in 1 : vector<8x2xf32>, vector<8x126xf32> -> vector<8x128xf32>
    %75 = tpu.concatenate %74, %71 in 0 : vector<8x128xf32>, vector<8x128xf32> -> vector<16x128xf32>
    %c0_31 = arith.constant 0 : index
    %c0_32 = arith.constant 0 : index
    %76 = vector.load %arg10[%c0_31, %c0_32] : memref<8x16xf32, #tpu.memory_space<vmem>>, vector<8x16xf32>
    %cst_33 = arith.constant dense<0.000000e+00> : vector<8x128xf32>
    %77 = tpu.matmul %76, %75, %cst_33 {dimension_numbers = #tpu.dot_dimension_numbers<[1], [0], [0], [1], [0, 0, 1, 1], [], []>} : vector<8x16xf32>, vector<16x128xf32>, vector<8x128xf32> -> vector<8x128xf32>
    %c0_34 = arith.constant 0 : index
    %c0_35 = arith.constant 0 : index
    %78 = vector.load %arg11[%c0_34, %c0_35] : memref<8x1xf32, #tpu.memory_space<vmem>>, vector<8x1xf32>
    %79 = vector.broadcast %78 : vector<8x1xf32> to vector<8x128xf32>
    %80 = arith.addf %77, %79 : vector<8x128xf32>
    %cst_36 = arith.constant 0.000000e+00 : f32
    %81 = vector.broadcast %cst_36 : f32 to vector<8x128xf32>
    %82 = arith.maximumf %80, %81 : vector<8x128xf32>
    %83 = arith.addf %82, %58 : vector<8x128xf32>
    %cst_37 = arith.constant 0.000000e+00 : f32
    %84 = vector.broadcast %cst_37 : f32 to vector<8x128xf32>
    %85 = arith.maximumf %83, %84 : vector<8x128xf32>
    %86 = vector.broadcast %16 : vector<1x128xf32> to vector<8x128xf32>
    %87 = arith.mulf %85, %86 : vector<8x128xf32>
    %cst_38 = arith.constant 0.000000e+00 : f32
    %88 = vector.broadcast %cst_38 : f32 to vector<8x4xf32>
    %89 = vector.extract_strided_slice %87 {offsets = [0, 0], sizes = [8, 124], strides = [1, 1]} : vector<8x128xf32> to vector<8x124xf32>
    %90 = tpu.concatenate %88, %89 in 1 : vector<8x4xf32>, vector<8x124xf32> -> vector<8x128xf32>
    %91 = tpu.concatenate %90, %87 in 0 : vector<8x128xf32>, vector<8x128xf32> -> vector<16x128xf32>
    %c0_39 = arith.constant 0 : index
    %c0_40 = arith.constant 0 : index
    %92 = vector.load %arg12[%c0_39, %c0_40] : memref<6x16xf32, #tpu.memory_space<vmem>>, vector<6x16xf32>
    %cst_41 = arith.constant dense<0.000000e+00> : vector<6x128xf32>
    %93 = tpu.matmul %92, %91, %cst_41 {dimension_numbers = #tpu.dot_dimension_numbers<[1], [0], [0], [1], [0, 0, 1, 1], [], []>} : vector<6x16xf32>, vector<16x128xf32>, vector<6x128xf32> -> vector<6x128xf32>
    %c0_42 = arith.constant 0 : index
    %c0_43 = arith.constant 0 : index
    %94 = vector.load %arg13[%c0_42, %c0_43] : memref<6x1xf32, #tpu.memory_space<vmem>>, vector<6x1xf32>
    %95 = vector.broadcast %94 : vector<6x1xf32> to vector<6x128xf32>
    %96 = arith.addf %93, %95 : vector<6x128xf32>
    %97 = vector.broadcast %16 : vector<1x128xf32> to vector<6x128xf32>
    %98 = arith.mulf %96, %97 : vector<6x128xf32>
    %cst_44 = arith.constant 0.000000e+00 : f32
    %99 = vector.broadcast %cst_44 : f32 to vector<6x4xf32>
    %100 = vector.extract_strided_slice %98 {offsets = [0, 0], sizes = [6, 124], strides = [1, 1]} : vector<6x128xf32> to vector<6x124xf32>
    %101 = tpu.concatenate %99, %100 in 1 : vector<6x4xf32>, vector<6x124xf32> -> vector<6x128xf32>
    %102 = tpu.concatenate %101, %98 in 0 : vector<6x128xf32>, vector<6x128xf32> -> vector<12x128xf32>
    %c0_45 = arith.constant 0 : index
    %c0_46 = arith.constant 0 : index
    %103 = vector.load %arg14[%c0_45, %c0_46] : memref<6x12xf32, #tpu.memory_space<vmem>>, vector<6x12xf32>
    %cst_47 = arith.constant dense<0.000000e+00> : vector<6x128xf32>
    %104 = tpu.matmul %103, %102, %cst_47 {dimension_numbers = #tpu.dot_dimension_numbers<[1], [0], [0], [1], [0, 0, 1, 1], [], []>} : vector<6x12xf32>, vector<12x128xf32>, vector<6x128xf32> -> vector<6x128xf32>
    %c0_48 = arith.constant 0 : index
    %c0_49 = arith.constant 0 : index
    %105 = vector.load %arg15[%c0_48, %c0_49] : memref<6x1xf32, #tpu.memory_space<vmem>>, vector<6x1xf32>
    %106 = vector.broadcast %105 : vector<6x1xf32> to vector<6x128xf32>
    %107 = arith.addf %104, %106 : vector<6x128xf32>
    %c0_50 = arith.constant 0 : index
    %c0_51 = arith.constant 0 : index
    %108 = vector.load %arg16[%c0_50, %c0_51] : memref<6x8xf32, #tpu.memory_space<vmem>>, vector<6x8xf32>
    %cst_52 = arith.constant dense<0.000000e+00> : vector<6x128xf32>
    %109 = tpu.matmul %108, %87, %cst_52 {dimension_numbers = #tpu.dot_dimension_numbers<[1], [0], [0], [1], [0, 0, 1, 1], [], []>} : vector<6x8xf32>, vector<8x128xf32>, vector<6x128xf32> -> vector<6x128xf32>
    %c0_53 = arith.constant 0 : index
    %c0_54 = arith.constant 0 : index
    %110 = vector.load %arg17[%c0_53, %c0_54] : memref<6x1xf32, #tpu.memory_space<vmem>>, vector<6x1xf32>
    %111 = vector.broadcast %110 : vector<6x1xf32> to vector<6x128xf32>
    %112 = arith.addf %109, %111 : vector<6x128xf32>
    %113 = arith.addf %107, %112 : vector<6x128xf32>
    %114 = vector.broadcast %16 : vector<1x128xf32> to vector<6x128xf32>
    %115 = arith.mulf %113, %114 : vector<6x128xf32>
    %116 = vector.extract_strided_slice %115 {offsets = [0, 4], sizes = [6, 16], strides = [1, 1]} : vector<6x128xf32> to vector<6x16xf32>
    %c0_55 = arith.constant 0 : index
    %c0_56 = arith.constant 0 : index
    %c0_57 = arith.constant 0 : index
    %117 = vector.load %arg18[%c0_55, %c0_56, %c0_57] : memref<2x6x16xf32, #tpu.memory_space<vmem>>, vector<1x6x16xf32>
    %118 = vector.shape_cast %117 : vector<1x6x16xf32> to vector<6x16xf32>
    %119 = vector.shape_cast %116 : vector<6x16xf32> to vector<1x6x16xf32>
    tpu.vector_store %arg18[%c0_55, %c0_56, %c0_57], %119 {strides = array<i32>} : memref<2x6x16xf32, #tpu.memory_space<vmem>>, vector<1x6x16xf32>,
    %120 = vector.extract_strided_slice %115 {offsets = [0, 24], sizes = [6, 16], strides = [1, 1]} : vector<6x128xf32> to vector<6x16xf32>
    %c1 = arith.constant 1 : index
    %c0_58 = arith.constant 0 : index
    %c0_59 = arith.constant 0 : index
    %121 = vector.load %arg18[%c1, %c0_58, %c0_59] : memref<2x6x16xf32, #tpu.memory_space<vmem>>, vector<1x6x16xf32>
    %122 = vector.shape_cast %121 : vector<1x6x16xf32> to vector<6x16xf32>
    %123 = vector.shape_cast %120 : vector<6x16xf32> to vector<1x6x16xf32>
    tpu.vector_store %arg18[%c1, %c0_58, %c0_59], %123 {strides = array<i32>} : memref<2x6x16xf32, #tpu.memory_space<vmem>>, vector<1x6x16xf32>,
    return
  }
  func.func @transform_0(%arg0: i32) -> (i32, i32, i32) {
    %c0_i32 = arith.constant 0 : i32
    %c0_i32_0 = arith.constant 0 : i32
    %c0_i32_1 = arith.constant 0 : i32
    return %arg0, %c0_i32, %c0_i32_0 : i32, i32, i32
  }
  func.func @transform_1(%arg0: i32) -> (i32, i32) {
    %c0_i32 = arith.constant 0 : i32
    %c0_i32_0 = arith.constant 0 : i32
    %c0_i32_1 = arith.constant 0 : i32
    return %c0_i32, %c0_i32_0 : i32, i32
  }
  func.func @transform_2(%arg0: i32) -> (i32, i32) {
    %c0_i32 = arith.constant 0 : i32
    %c0_i32_0 = arith.constant 0 : i32
    %c0_i32_1 = arith.constant 0 : i32
    return %c0_i32, %c0_i32_0 : i32, i32
  }
  func.func @transform_3(%arg0: i32) -> (i32, i32) {
    %c0_i32 = arith.constant 0 : i32
    %c0_i32_0 = arith.constant 0 : i32
    %c0_i32_1 = arith.constant 0 : i32
    return %c0_i32, %c0_i32_0 : i32, i32
  }
  func.func @transform_4(%arg0: i32) -> (i32, i32) {
    %c0_i32 = arith.constant 0 : i32
    %c0_i32_0 = arith.constant 0 : i32
    %c0_i32_1 = arith.constant 0 : i32
    return %c0_i32, %c0_i32_0 : i32, i32
  }
  func.func @transform_5(%arg0: i32) -> (i32, i32) {
    %c0_i32 = arith.constant 0 : i32
    %c0_i32_0 = arith.constant 0 : i32
    %c0_i32_1 = arith.constant 0 : i32
    return %c0_i32, %c0_i32_0 : i32, i32
  }
  func.func @transform_6(%arg0: i32) -> (i32, i32) {
    %c0_i32 = arith.constant 0 : i32
    %c0_i32_0 = arith.constant 0 : i32
    %c0_i32_1 = arith.constant 0 : i32
    return %c0_i32, %c0_i32_0 : i32, i32
  }
  func.func @transform_7(%arg0: i32) -> (i32, i32) {
    %c0_i32 = arith.constant 0 : i32
    %c0_i32_0 = arith.constant 0 : i32
    %c0_i32_1 = arith.constant 0 : i32
    return %c0_i32, %c0_i32_0 : i32, i32
  }
  func.func @transform_8(%arg0: i32) -> (i32, i32) {
    %c0_i32 = arith.constant 0 : i32
    %c0_i32_0 = arith.constant 0 : i32
    %c0_i32_1 = arith.constant 0 : i32
    return %c0_i32, %c0_i32_0 : i32, i32
  }
  func.func @transform_9(%arg0: i32) -> (i32, i32) {
    %c0_i32 = arith.constant 0 : i32
    %c0_i32_0 = arith.constant 0 : i32
    %c0_i32_1 = arith.constant 0 : i32
    return %c0_i32, %c0_i32_0 : i32, i32
  }
  func.func @transform_10(%arg0: i32) -> (i32, i32) {
    %c0_i32 = arith.constant 0 : i32
    %c0_i32_0 = arith.constant 0 : i32
    %c0_i32_1 = arith.constant 0 : i32
    return %c0_i32, %c0_i32_0 : i32, i32
  }
  func.func @transform_11(%arg0: i32) -> (i32, i32) {
    %c0_i32 = arith.constant 0 : i32
    %c0_i32_0 = arith.constant 0 : i32
    %c0_i32_1 = arith.constant 0 : i32
    return %c0_i32, %c0_i32_0 : i32, i32
  }
  func.func @transform_12(%arg0: i32) -> (i32, i32) {
    %c0_i32 = arith.constant 0 : i32
    %c0_i32_0 = arith.constant 0 : i32
    %c0_i32_1 = arith.constant 0 : i32
    return %c0_i32, %c0_i32_0 : i32, i32
  }
  func.func @transform_13(%arg0: i32) -> (i32, i32) {
    %c0_i32 = arith.constant 0 : i32
    %c0_i32_0 = arith.constant 0 : i32
    %c0_i32_1 = arith.constant 0 : i32
    return %c0_i32, %c0_i32_0 : i32, i32
  }
  func.func @transform_14(%arg0: i32) -> (i32, i32) {
    %c0_i32 = arith.constant 0 : i32
    %c0_i32_0 = arith.constant 0 : i32
    %c0_i32_1 = arith.constant 0 : i32
    return %c0_i32, %c0_i32_0 : i32, i32
  }
  func.func @transform_15(%arg0: i32) -> (i32, i32) {
    %c0_i32 = arith.constant 0 : i32
    %c0_i32_0 = arith.constant 0 : i32
    %c0_i32_1 = arith.constant 0 : i32
    return %c0_i32, %c0_i32_0 : i32, i32
  }
  func.func @transform_16(%arg0: i32) -> (i32, i32) {
    %c0_i32 = arith.constant 0 : i32
    %c0_i32_0 = arith.constant 0 : i32
    %c0_i32_1 = arith.constant 0 : i32
    return %c0_i32, %c0_i32_0 : i32, i32
  }
  func.func @transform_17(%arg0: i32) -> (i32, i32, i32) {
    %c0_i32 = arith.constant 0 : i32
    %c0_i32_0 = arith.constant 0 : i32
    %c0_i32_1 = arith.constant 0 : i32
    return %arg0, %c0_i32, %c0_i32_0 : i32, i32, i32
  }
}

</mosaic_0001>

<bundles_post_ra>
// kernel: tpu_custom_call.1
= control target key start
LH: loop header
LB: loop body
LE: loop exit
PB: predicated region body
PF: predicated region fallthrough
CT: control target
= control target key end

     0   :  { %s3434_s0 = inlined_call_operand.hbm [shape: f32[4,4,16], index: 0, kind: input, shape index: {}]   ;;  %s3435_s1 = inlined_call_operand.hbm [shape: f32[8,8], index: 1, kind: input, shape index: {}]   ;;  %s3436_s2 = inlined_call_operand.hbm [shape: f32[8,1], index: 2, kind: input, shape index: {}]   ;;  %s3437_s3 = inlined_call_operand.hbm [shape: f32[8,16], index: 3, kind: input, shape index: {}]   ;;  %s3438_s4 = inlined_call_operand.hbm [shape: f32[8,1], index: 4, kind: input, shape index: {}]   ;;  %s3439_s5 = inlined_call_operand.hbm [shape: f32[8,4], index: 5, kind: input, shape index: {}]   ;;  %s3440_s6 = inlined_call_operand.hbm [shape: f32[8,1], index: 6, kind: input, shape index: {}]   ;;  %s3441_s7 = inlined_call_operand.hbm [shape: f32[8,16], index: 7, kind: input, shape index: {}]   ;;  %s3442_s8 = inlined_call_operand.hbm [shape: f32[8,1], index: 8, kind: input, shape index: {}]   ;;  %s3443_s9 = inlined_call_operand.hbm [shape: f32[8,16], index: 9, kind: input, shape index: {}]   ;;  %s3444_s10 = inlined_call_operand.hbm [shape: f32[8,1], index: 10, kind: input, shape index: {}]   ;;  %s3445_s11 = inlined_call_operand.hbm [shape: f32[6,16], index: 11, kind: input, shape index: {}]   ;;  %s3446_s12 = inlined_call_operand.hbm [shape: f32[6,1], index: 12, kind: input, shape index: {}]   ;;  %s3447_s13 = inlined_call_operand.hbm [shape: f32[6,12], index: 13, kind: input, shape index: {}]   ;;  %s3448_s14 = inlined_call_operand.hbm [shape: f32[6,1], index: 14, kind: input, shape index: {}]   ;;  %s3449_s15 = inlined_call_operand.hbm [shape: f32[6,8], index: 15, kind: input, shape index: {}]   ;;  %s3450_s16 = inlined_call_operand.hbm [shape: f32[6,1], index: 16, kind: input, shape index: {}]   ;;  %s3451_s17 = inlined_call_operand.hbm [shape: f32[4,6,16], index: 17, kind: output, shape index: {}]  }
   0x1   :  { %3467 = sst [smem:[#allocation46_spill]] %s3434_s0 }
   0x2   :  { %3468 = sst [smem:[#allocation47_spill]] %s3435_s1 }
   0x3   :  { %3469 = sst [smem:[#allocation48_spill]] %s3436_s2 }
   0x4   :  { %3470 = sst [smem:[#allocation49_spill]] %s3437_s3 }
   0x5   :  { %3471 = sst [smem:[#allocation50_spill]] %s3438_s4 }
   0x6   :  { %3472 = sst [smem:[#allocation51_spill]] %s3451_s17 }
   0x7   :  { %22 = vsyncpa [#allocation3], 0 }
   0x8   :  { %24 = vsyncpa [#allocation3 + $0x1], 0 }
   0x9   :  { %25 = vsyncpa [#allocation6], 0 }
   0xa   :  { %26 = vsyncpa [#allocation9], 0 }
   0xb   :  { %27 = vsyncpa [#allocation12], 0 }
   0xc   :  { %28 = vsyncpa [#allocation15], 0 }
   0xd   :  { %29 = vsyncpa [#allocation18], 0 }
   0xe   :  { %30 = vsyncpa [#allocation21], 0 }
   0xf   :  { %31 = vsyncpa [#allocation24], 0 }
  0x10   :  { %32 = vsyncpa [#allocation27], 0 }
  0x11   :  { %33 = vsyncpa [#allocation4], 0 }
  0x12   :  { %35 = vsyncpa [#allocation4 + $0x1], 0  ;;  %s2840_s24 = smov 0   ;;  %s2842_s25 = smov 0  }
  0x13   :  { %s2844_s26 = smov 0   ;;  %s2846_s27 = smov 0  }
  0x14 LB: > { %3473 = sst [smem:[#allocation40_spill]] %s2703_s24  ;;  %s2717_s28 = smov [#allocation5]   ;;  %s2715_s27 = sphi %s2846_s27, %s3529_s27   ;;  %s2711_s26 = sphi %s2844_s26, %s3528_s26   ;;  %s2707_s25 = sphi %s2842_s25, %s3527_s25   ;;  %s2703_s24 = sphi %s2840_s24, %s3526_s24  }
  0x15   : > { %3474 = sst [smem:[#allocation41_spill]] %s2707_s25  ;;  %s447_s29 = sshll.u32 %s2717_s28, 4  ;;  %s2866_s29 = int_to_ptr.vmem [resolvable:$true] %s447_s29 }
  0x16   : > { %3475 = sst [smem:[#allocation42_spill]] %s2711_s26  ;;  %s2861_s0 = sadd.s32 4294967295, %s2715_s27  }
  0x17   : > { %3476 = sst [smem:[#allocation43_spill]] %s2715_s27  ;;  %p1753_p0 = scmp.ge.s32.totalorder %s2715_s27, 1 }
  0x18   : > { %3477 = sst [smem:[#allocation44_spill]] %s2861_s0  ;;  %p3463_p1 = scmp.eq.s32.totalorder %s2861_s0, 0 }
  0x19   : > { %p434_p2 = scmp.lt.s32.totalorder %s2715_s27, 3  ;;  %s2718_s18 = smov [#allocation8]  }
  0x1a   : > { %s469_s19 = sshll.u32 %s2718_s18, 4  ;;  %s2719_s1 = smov [#allocation11]   ;;  %s2875_s19 = int_to_ptr.vmem [resolvable:$true] %s469_s19 }
  0x1b   : > { %p2868_p3 = pnand %p1753_p0, %p434_p2  ;;  %s491_s20 = sshll.u32 %s2719_s1, 4  ;;  %s2883_s20 = int_to_ptr.vmem [resolvable:$true] %s491_s20 }
  0x1c   : > { %s2720_s22 = smov [#allocation14]  }
  0x1d   : > { %s3478_s30 = scalar_select %p2868_p3, 1, 0 }
  0x1e   : > { %p1983_p5 = pneg %p2868_p3  ;;  %s2885_s23 = sshll.u32 %s2720_s22, 4  ;;  %s514_s23 = int_to_ptr.vmem [resolvable:$true] %s2885_s23 }
  0x1f   : > { %3479 = sst [smem:[#allocation45_spill]] %s3478_s30  ;;  %s3481_s30 = sld [smem:[#allocation47_spill]] }
  0x20   : > { %p2879_p6 = pnand %p1983_p5, %p3463_p1 }
  0x22   : > { %p2895_p8 = pneg %p2879_p6 }
  0x25   : > { %s2139_s24 = scalar_lea.hbm %s3481_s30, 128 }
  0x26   : > { %p2140_p7 = scmp.ne.s32.totalorder %s3481_s30, %s2139_s24  ;;  %p2146_p11 = scmp.lt.u32.totalorder %s2139_s24, %s3481_s30 }
  0x28   : > { %p2142_p9 = pnand %p2895_p8, %p2140_p7 }
  0x2a   : > { %p2143_p10 = pneg %p2142_p9 }
  0x2c   : > { %p2148_p12 = pnand %p2146_p11, %p2143_p10 }
  0x2e   : > { %2151 = shalt.err (!%p2148_p12)
}
  0x2f   : > { %s2152_s17 = scalar_lea.vmem %s2866_s29, 128  ;;  %p2160_p5 = scmp.lt.s32.totalorder %s2866_s29, %s2866_s29 }
  0x30   : > { %p2153_p13 = scmp.ne.s32.totalorder %s2866_s29, %s2152_s17  ;;  %p2161_p4 = scmp.lt.s32.totalorder %s2152_s17, %s2152_s17 }
  0x32   : > { %p2155_p0 = pnand %p2153_p13, %p2895_p8  ;;  %p2162_p7 = por %p2161_p4, %p2160_p5 }
  0x34   : > { %p2156_p2 = pneg %p2155_p0 }
  0x36   : > { %p2163_p9 = pnand %p2162_p7, %p2156_p2 }
  0x38   : > { %2166 = shalt.err (!%p2163_p9)
}
  0x39   : > { %1986 = dma.hbm_to_vmem [thread:$0]  (!%p2879_p6), %s3481_s30, 128, %s2866_s29, [#allocation6]  }
  0x3a   : > { %s3483_s3 = sld [smem:[#allocation49_spill]] }
  0x40   : > { %s2167_s18 = scalar_lea.hbm %s3483_s3, 128 }
  0x41   : > { %p2168_p10 = scmp.ne.s32.totalorder %s3483_s3, %s2167_s18  ;;  %p2174_p12 = scmp.lt.u32.totalorder %s2167_s18, %s3483_s3 }
  0x43   : > { %p2170_p4 = pnand %p2168_p10, %p2895_p8 }
  0x45   : > { %p2171_p11 = pneg %p2170_p4 }
  0x47   : > { %p2176_p13 = pnand %p2174_p12, %p2171_p11 }
  0x49   : > { %2179 = shalt.err (!%p2176_p13)
}
  0x4a   : > { %s2180_s29 = scalar_lea.vmem %s2875_s19, 128  ;;  %p2188_p7 = scmp.lt.s32.totalorder %s2875_s19, %s2875_s19 }
  0x4b   : > { %p2181_p0 = scmp.ne.s32.totalorder %s2875_s19, %s2180_s29  ;;  %p2189_p9 = scmp.lt.s32.totalorder %s2180_s29, %s2180_s29 }
  0x4d   : > { %p2183_p2 = pnand %p2181_p0, %p2895_p8  ;;  %p2190_p10 = por %p2189_p9, %p2188_p7 }
  0x4f   : > { %p2184_p5 = pneg %p2183_p2 }
  0x51   : > { %p2191_p4 = pnand %p2190_p10, %p2184_p5 }
  0x53   : > { %2194 = shalt.err (!%p2191_p4)
}
  0x54   : > { %1992 = dma.hbm_to_vmem [thread:$0]  (!%p2879_p6), %s3483_s3, 128, %s2875_s19, [#allocation9]  }
  0x55   : > { %s2195_s0 = scalar_lea.hbm %s3439_s5, 128 }
  0x56   : > { %p2196_p11 = scmp.ne.s32.totalorder %s3439_s5, %s2195_s0  ;;  %p2202_p0 = scmp.lt.u32.totalorder %s2195_s0, %s3439_s5 }
  0x58   : > { %p2198_p12 = pnand %p2196_p11, %p2895_p8 }
  0x5a   : > { %p2199_p13 = pneg %p2198_p12 }
  0x5c   : > { %p2204_p2 = pnand %p2202_p0, %p2199_p13 }
  0x5e   : > { %2207 = shalt.err (!%p2204_p2)
}
  0x5f   : > { %s2208_s19 = scalar_lea.vmem %s2883_s20, 128  ;;  %p2216_p10 = scmp.lt.s32.totalorder %s2883_s20, %s2883_s20 }
  0x60   : > { %p2209_p5 = scmp.ne.s32.totalorder %s2883_s20, %s2208_s19  ;;  %p2217_p4 = scmp.lt.s32.totalorder %s2208_s19, %s2208_s19 }
  0x62   : > { %p2211_p7 = pnand %p2209_p5, %p2895_p8  ;;  %p2218_p11 = por %p2217_p4, %p2216_p10 }
  0x64   : > { %p2212_p9 = pneg %p2211_p7 }
  0x66   : > { %p2219_p12 = pnand %p2218_p11, %p2212_p9 }
  0x68   : > { %2222 = shalt.err (!%p2219_p12)
}
  0x69   : > { %1998 = dma.hbm_to_vmem [thread:$0]  (!%p2879_p6), %s3439_s5, 128, %s2883_s20, [#allocation12]  }
  0x6a   : > { %s2721_s27 = smov [#allocation17]   ;;  %s2223_s28 = scalar_lea.hbm %s3441_s7, 128 }
  0x6b   : > { %s535_s24 = sshll.u32 %s2721_s27, 4  ;;  %p2224_p13 = scmp.ne.s32.totalorder %s3441_s7, %s2223_s28  ;;  %s536_s24 = int_to_ptr.vmem [resolvable:$true] %s535_s24 }
  0x6c   : > { %p2230_p5 = scmp.lt.u32.totalorder %s2223_s28, %s3441_s7 }
  0x6d   : > { %p2226_p0 = pnand %p2224_p13, %p2895_p8 }
  0x6f   : > { %p2227_p2 = pneg %p2226_p0 }
  0x71   : > { %p2232_p7 = pnand %p2230_p5, %p2227_p2 }
  0x73   : > { %2235 = shalt.err (!%p2232_p7)
}
  0x74   : > { %s2236_s20 = scalar_lea.vmem %s514_s23, 128  ;;  %p2244_p11 = scmp.lt.s32.totalorder %s514_s23, %s514_s23 }
  0x75   : > { %p2237_p9 = scmp.ne.s32.totalorder %s514_s23, %s2236_s20  ;;  %p2245_p12 = scmp.lt.s32.totalorder %s2236_s20, %s2236_s20 }
  0x77   : > { %p2239_p10 = pnand %p2237_p9, %p2895_p8  ;;  %p2246_p1 = por %p2245_p12, %p2244_p11 }
  0x79   : > { %p2240_p4 = pneg %p2239_p10 }
  0x7b   : > { %p2247_p3 = pnand %p2246_p1, %p2240_p4 }
  0x7d   : > { %2250 = shalt.err (!%p2247_p3)
}
  0x7e   : > { %2004 = dma.hbm_to_vmem [thread:$0]  (!%p2879_p6), %s3441_s7, 128, %s514_s23, [#allocation15]  }
  0x7f   : > { %s2251_s0 = scalar_lea.hbm %s3443_s9, 128 }
  0x80   : > { %p2252_p13 = scmp.ne.s32.totalorder %s3443_s9, %s2251_s0  ;;  %p2258_p3 = scmp.lt.u32.totalorder %s2251_s0, %s3443_s9 }
  0x82   : > { %p2254_p0 = pnand %p2252_p13, %p2895_p8 }
  0x84   : > { %p2255_p1 = pneg %p2254_p0 }
  0x86   : > { %p2260_p2 = pnand %p2258_p3, %p2255_p1 }
  0x88   : > { %2263 = shalt.err (!%p2260_p2)
}
  0x89   : > { %s2264_s19 = scalar_lea.vmem %s536_s24, 128  ;;  %p2272_p10 = scmp.lt.s32.totalorder %s536_s24, %s536_s24 }
  0x8a   : > { %p2265_p5 = scmp.ne.s32.totalorder %s536_s24, %s2264_s19  ;;  %p2273_p4 = scmp.lt.s32.totalorder %s2264_s19, %s2264_s19 }
  0x8c   : > { %p2267_p7 = pnand %p2265_p5, %p2895_p8  ;;  %p2274_p11 = por %p2273_p4, %p2272_p10 }
  0x8e   : > { %p2268_p9 = pneg %p2267_p7 }
  0x90   : > { %p2275_p12 = pnand %p2274_p11, %p2268_p9 }
  0x92   : > { %2278 = shalt.err (!%p2275_p12)
}
  0x93   : > { %2010 = dma.hbm_to_vmem [thread:$0]  (!%p2879_p6), %s3443_s9, 128, %s536_s24, [#allocation18]  }
  0x94   : > { %s2722_s29 = smov [#allocation20]   ;;  %s2723_s27 = smov [#allocation23]  }
  0x95   : > { %s557_s26 = sshll.u32 %s2722_s29, 4  ;;  %s579_s25 = sshll.u32 %s2723_s27, 4  ;;  %s558_s26 = int_to_ptr.vmem [resolvable:$true] %s557_s26  ;;  %s580_s25 = int_to_ptr.vmem [resolvable:$true] %s579_s25 }
  0x96   : > { %s2279_s18 = scalar_lea.hbm %s3445_s11, 128 }
  0x97   : > { %p2280_p13 = scmp.ne.s32.totalorder %s3445_s11, %s2279_s18  ;;  %p2286_p3 = scmp.lt.u32.totalorder %s2279_s18, %s3445_s11 }
  0x99   : > { %p2282_p0 = pnand %p2280_p13, %p2895_p8 }
  0x9b   : > { %p2283_p1 = pneg %p2282_p0 }
  0x9d   : > { %p2288_p2 = pnand %p2286_p3, %p2283_p1 }
  0x9f   : > { %2291 = shalt.err (!%p2288_p2)
}
  0xa0   : > { %s2292_s24 = scalar_lea.vmem %s558_s26, 128  ;;  %p2300_p10 = scmp.lt.s32.totalorder %s558_s26, %s558_s26 }
  0xa1   : > { %p2293_p5 = scmp.ne.s32.totalorder %s558_s26, %s2292_s24  ;;  %p2301_p4 = scmp.lt.s32.totalorder %s2292_s24, %s2292_s24 }
  0xa3   : > { %p2295_p7 = pnand %p2293_p5, %p2895_p8  ;;  %p2302_p11 = por %p2301_p4, %p2300_p10 }
  0xa5   : > { %p2296_p9 = pneg %p2295_p7 }
  0xa7   : > { %p2303_p12 = pnand %p2302_p11, %p2296_p9 }
  0xa9   : > { %2306 = shalt.err (!%p2303_p12)
}
  0xaa   : > { %2016 = dma.hbm_to_vmem [thread:$0]  (!%p2879_p6), %s3445_s11, 128, %s558_s26, [#allocation21]  }
  0xab   : > { %s2307_s28 = scalar_lea.hbm %s3447_s13, 128 }
  0xac   : > { %p2308_p13 = scmp.ne.s32.totalorder %s3447_s13, %s2307_s28  ;;  %p2314_p3 = scmp.lt.u32.totalorder %s2307_s28, %s3447_s13 }
  0xae   : > { %p2310_p0 = pnand %p2308_p13, %p2895_p8 }
  0xb0   : > { %p2311_p1 = pneg %p2310_p0 }
  0xb2   : > { %p2316_p2 = pnand %p2314_p3, %p2311_p1 }
  0xb4   : > { %2319 = shalt.err (!%p2316_p2)
}
  0xb5   : > { %s2320_s23 = scalar_lea.vmem %s580_s25, 128  ;;  %p2328_p10 = scmp.lt.s32.totalorder %s580_s25, %s580_s25 }
  0xb6   : > { %p2321_p5 = scmp.ne.s32.totalorder %s580_s25, %s2320_s23  ;;  %p2329_p4 = scmp.lt.s32.totalorder %s2320_s23, %s2320_s23 }
  0xb8   : > { %p2323_p7 = pnand %p2321_p5, %p2895_p8  ;;  %p2330_p11 = por %p2329_p4, %p2328_p10 }
  0xba   : > { %p2324_p9 = pneg %p2323_p7 }
  0xbc   : > { %p2331_p12 = pnand %p2330_p11, %p2324_p9 }
  0xbe   : > { %2334 = shalt.err (!%p2331_p12)
}
  0xbf   : > { %2022 = dma.hbm_to_vmem [thread:$0]  (!%p2879_p6), %s3447_s13, 128, %s580_s25, [#allocation24]  }
  0xc0   : > { %s2724_s20 = smov [#allocation26]   ;;  %s2725_s27 = smov [#allocation7]  }
  0xc1   : > { %s601_s29 = sshll.u32 %s2724_s20, 4  ;;  %s458_s0 = sshll.u32 %s2725_s27, 4  ;;  %s602_s29 = int_to_ptr.vmem [resolvable:$true] %s601_s29  ;;  %s459_s0 = int_to_ptr.vmem [resolvable:$true] %s458_s0 }
  0xc2   : > { %s2335_s22 = scalar_lea.hbm %s3449_s15, 128 }
  0xc3   : > { %p2336_p13 = scmp.ne.s32.totalorder %s3449_s15, %s2335_s22  ;;  %p2342_p3 = scmp.lt.u32.totalorder %s2335_s22, %s3449_s15 }
  0xc5   : > { %p2338_p0 = pnand %p2336_p13, %p2895_p8 }
  0xc7   : > { %p2339_p1 = pneg %p2338_p0 }
  0xc9   : > { %p2344_p2 = pnand %p2342_p3, %p2339_p1 }
  0xcb   : > { %2347 = shalt.err (!%p2344_p2)
}
  0xcc   : > { %s2348_s25 = scalar_lea.vmem %s602_s29, 128  ;;  %p2356_p10 = scmp.lt.s32.totalorder %s602_s29, %s602_s29 }
  0xcd   : > { %p2349_p5 = scmp.ne.s32.totalorder %s602_s29, %s2348_s25  ;;  %p2357_p4 = scmp.lt.s32.totalorder %s2348_s25, %s2348_s25 }
  0xcf   : > { %p2351_p7 = pnand %p2349_p5, %p2895_p8  ;;  %p2358_p11 = por %p2357_p4, %p2356_p10 }
  0xd1   : > { %p2352_p9 = pneg %p2351_p7 }
  0xd3   : > { %p2359_p12 = pnand %p2358_p11, %p2352_p9 }
  0xd5   : > { %2362 = shalt.err (!%p2359_p12)
}
  0xd6   : > { %2028 = dma.hbm_to_vmem [thread:$0]  (!%p2879_p6), %s3449_s15, 128, %s602_s29, [#allocation27]  }
  0xd7   : > { %s3484_s2 = sld [smem:[#allocation48_spill]] }
  0xdd   : > { %s2363_s18 = scalar_lea.hbm %s3484_s2, 128 }
  0xde   : > { %p2364_p13 = scmp.ne.s32.totalorder %s3484_s2, %s2363_s18  ;;  %p2370_p3 = scmp.lt.u32.totalorder %s2363_s18, %s3484_s2 }
  0xe0   : > { %p2366_p0 = pnand %p2364_p13, %p2895_p8 }
  0xe2   : > { %p2367_p1 = pneg %p2366_p0 }
  0xe4   : > { %p2372_p2 = pnand %p2370_p3, %p2367_p1 }
  0xe6   : > { %2375 = shalt.err (!%p2372_p2)
}
  0xe7   : > { %s2376_s26 = scalar_lea.vmem %s459_s0, 128  ;;  %p2384_p10 = scmp.lt.s32.totalorder %s459_s0, %s459_s0 }
  0xe8   : > { %p2377_p5 = scmp.ne.s32.totalorder %s459_s0, %s2376_s26  ;;  %p2385_p4 = scmp.lt.s32.totalorder %s2376_s26, %s2376_s26 }
  0xea   : > { %p2379_p7 = pnand %p2377_p5, %p2895_p8  ;;  %p2386_p11 = por %p2385_p4, %p2384_p10 }
  0xec   : > { %p2380_p9 = pneg %p2379_p7 }
  0xee   : > { %p2387_p12 = pnand %p2386_p11, %p2380_p9 }
  0xf0   : > { %2390 = shalt.err (!%p2387_p12)
}
  0xf1   : > { %1989 = dma.hbm_to_vmem [thread:$0]  (!%p2879_p6), %s3484_s2, 128, %s459_s0, [#allocation6]  }
  0xf2   : > { %s2726_s24 = smov [#allocation10]   ;;  %s2727_s27 = smov [#allocation13]  }
  0xf3   : > { %s480_s20 = sshll.u32 %s2726_s24, 4  ;;  %s502_s28 = sshll.u32 %s2727_s27, 4  ;;  %s481_s20 = int_to_ptr.vmem [resolvable:$true] %s480_s20  ;;  %s503_s28 = int_to_ptr.vmem [resolvable:$true] %s502_s28 }
  0xf4   : > { %s3485_s4 = sld [smem:[#allocation50_spill]] }
  0xfa   : > { %s2391_s17 = scalar_lea.hbm %s3485_s4, 128 }
  0xfb   : > { %p2392_p13 = scmp.ne.s32.totalorder %s3485_s4, %s2391_s17  ;;  %p2398_p3 = scmp.lt.u32.totalorder %s2391_s17, %s3485_s4 }
  0xfd   : > { %p2394_p0 = pnand %p2392_p13, %p2895_p8 }
  0xff   : > { %p2395_p1 = pneg %p2394_p0 }
 0x101   : > { %p2400_p2 = pnand %p2398_p3, %p2395_p1 }
 0x103   : > { %2403 = shalt.err (!%p2400_p2)
}
 0x104   : > { %s2404_s0 = scalar_lea.vmem %s481_s20, 128  ;;  %p2412_p10 = scmp.lt.s32.totalorder %s481_s20, %s481_s20 }
 0x105   : > { %p2405_p5 = scmp.ne.s32.totalorder %s481_s20, %s2404_s0  ;;  %p2413_p4 = scmp.lt.s32.totalorder %s2404_s0, %s2404_s0 }
 0x107   : > { %p2407_p7 = pnand %p2405_p5, %p2895_p8  ;;  %p2414_p11 = por %p2413_p4, %p2412_p10 }
 0x109   : > { %p2408_p9 = pneg %p2407_p7 }
 0x10b   : > { %p2415_p12 = pnand %p2414_p11, %p2408_p9 }
 0x10d   : > { %2418 = shalt.err (!%p2415_p12)
}
 0x10e   : > { %1995 = dma.hbm_to_vmem [thread:$0]  (!%p2879_p6), %s3485_s4, 128, %s481_s20, [#allocation9]  }
 0x10f   : > { %s2419_s22 = scalar_lea.hbm %s3440_s6, 128 }
 0x110   : > { %p2420_p13 = scmp.ne.s32.totalorder %s3440_s6, %s2419_s22  ;;  %p2426_p3 = scmp.lt.u32.totalorder %s2419_s22, %s3440_s6 }
 0x112   : > { %p2422_p0 = pnand %p2420_p13, %p2895_p8 }
 0x114   : > { %p2423_p1 = pneg %p2422_p0 }
 0x116   : > { %p2428_p2 = pnand %p2426_p3, %p2423_p1 }
 0x118   : > { %2431 = shalt.err (!%p2428_p2)
}
 0x119   : > { %s2432_s29 = scalar_lea.vmem %s503_s28, 128  ;;  %p2440_p10 = scmp.lt.s32.totalorder %s503_s28, %s503_s28 }
 0x11a   : > { %p2433_p5 = scmp.ne.s32.totalorder %s503_s28, %s2432_s29  ;;  %p2441_p4 = scmp.lt.s32.totalorder %s2432_s29, %s2432_s29 }
 0x11c   : > { %p2435_p7 = pnand %p2433_p5, %p2895_p8  ;;  %p2442_p11 = por %p2441_p4, %p2440_p10 }
 0x11e   : > { %p2436_p9 = pneg %p2435_p7 }
 0x120   : > { %p2443_p12 = pnand %p2442_p11, %p2436_p9 }
 0x122   : > { %2446 = shalt.err (!%p2443_p12)
}
 0x123   : > { %2001 = dma.hbm_to_vmem [thread:$0]  (!%p2879_p6), %s3440_s6, 128, %s503_s28, [#allocation12]  }
 0x124   : > { %s2728_s25 = smov [#allocation16]   ;;  %s2729_s27 = smov [#allocation19]  }
 0x125   : > { %s524_s24 = sshll.u32 %s2728_s25, 4  ;;  %s546_s18 = sshll.u32 %s2729_s27, 4  ;;  %s525_s24 = int_to_ptr.vmem [resolvable:$true] %s524_s24  ;;  %s547_s18 = int_to_ptr.vmem [resolvable:$true] %s546_s18 }
 0x126   : > { %s2447_s19 = scalar_lea.hbm %s3442_s8, 128 }
 0x127   : > { %p2448_p13 = scmp.ne.s32.totalorder %s3442_s8, %s2447_s19  ;;  %p2454_p3 = scmp.lt.u32.totalorder %s2447_s19, %s3442_s8 }
 0x129   : > { %p2450_p0 = pnand %p2448_p13, %p2895_p8 }
 0x12b   : > { %p2451_p1 = pneg %p2450_p0 }
 0x12d   : > { %p2456_p2 = pnand %p2454_p3, %p2451_p1 }
 0x12f   : > { %2459 = shalt.err (!%p2456_p2)
}
 0x130   : > { %s2460_s28 = scalar_lea.vmem %s525_s24, 128  ;;  %p2468_p10 = scmp.lt.s32.totalorder %s525_s24, %s525_s24 }
 0x131   : > { %p2461_p5 = scmp.ne.s32.totalorder %s525_s24, %s2460_s28  ;;  %p2469_p4 = scmp.lt.s32.totalorder %s2460_s28, %s2460_s28 }
 0x133   : > { %p2463_p7 = pnand %p2461_p5, %p2895_p8  ;;  %p2470_p11 = por %p2469_p4, %p2468_p10 }
 0x135   : > { %p2464_p9 = pneg %p2463_p7 }
 0x137   : > { %p2471_p12 = pnand %p2470_p11, %p2464_p9 }
 0x139   : > { %2474 = shalt.err (!%p2471_p12)
}
 0x13a   : > { %2007 = dma.hbm_to_vmem [thread:$0]  (!%p2879_p6), %s3442_s8, 128, %s525_s24, [#allocation15]  }
 0x13b   : > { %s2475_s17 = scalar_lea.hbm %s3444_s10, 128 }
 0x13c   : > { %p2476_p13 = scmp.ne.s32.totalorder %s3444_s10, %s2475_s17  ;;  %p2482_p3 = scmp.lt.u32.totalorder %s2475_s17, %s3444_s10 }
 0x13e   : > { %p2478_p0 = pnand %p2476_p13, %p2895_p8 }
 0x140   : > { %p2479_p1 = pneg %p2478_p0 }
 0x142   : > { %p2484_p2 = pnand %p2482_p3, %p2479_p1 }
 0x144   : > { %2487 = shalt.err (!%p2484_p2)
}
 0x145   : > { %s2488_s20 = scalar_lea.vmem %s547_s18, 128  ;;  %p2496_p10 = scmp.lt.s32.totalorder %s547_s18, %s547_s18 }
 0x146   : > { %p2489_p5 = scmp.ne.s32.totalorder %s547_s18, %s2488_s20  ;;  %p2497_p4 = scmp.lt.s32.totalorder %s2488_s20, %s2488_s20 }
 0x148   : > { %p2491_p7 = pnand %p2489_p5, %p2895_p8  ;;  %p2498_p11 = por %p2497_p4, %p2496_p10 }
 0x14a   : > { %p2492_p9 = pneg %p2491_p7 }
 0x14c   : > { %p2499_p12 = pnand %p2498_p11, %p2492_p9 }
 0x14e   : > { %2502 = shalt.err (!%p2499_p12)
}
 0x14f   : > { %2013 = dma.hbm_to_vmem [thread:$0]  (!%p2879_p6), %s3444_s10, 128, %s547_s18, [#allocation18]  }
 0x150   : > { %s2730_s0 = smov [#allocation22]   ;;  %s2731_s27 = smov [#allocation25]  }
 0x151   : > { %s568_s25 = sshll.u32 %s2730_s0, 4  ;;  %s590_s22 = sshll.u32 %s2731_s27, 4  ;;  %s569_s25 = int_to_ptr.vmem [resolvable:$true] %s568_s25  ;;  %s591_s22 = int_to_ptr.vmem [resolvable:$true] %s590_s22 }
 0x152   : > { %s2503_s23 = scalar_lea.hbm %s3446_s12, 128 }
 0x153   : > { %p2504_p13 = scmp.ne.s32.totalorder %s3446_s12, %s2503_s23  ;;  %p2510_p3 = scmp.lt.u32.totalorder %s2503_s23, %s3446_s12 }
 0x155   : > { %p2506_p0 = pnand %p2504_p13, %p2895_p8 }
 0x157   : > { %p2507_p1 = pneg %p2506_p0 }
 0x159   : > { %p2512_p2 = pnand %p2510_p3, %p2507_p1 }
 0x15b   : > { %2515 = shalt.err (!%p2512_p2)
}
 0x15c   : > { %s2516_s18 = scalar_lea.vmem %s569_s25, 128  ;;  %p2524_p10 = scmp.lt.s32.totalorder %s569_s25, %s569_s25 }
 0x15d   : > { %p2517_p5 = scmp.ne.s32.totalorder %s569_s25, %s2516_s18  ;;  %p2525_p4 = scmp.lt.s32.totalorder %s2516_s18, %s2516_s18 }
 0x15f   : > { %p2519_p7 = pnand %p2517_p5, %p2895_p8  ;;  %p2526_p11 = por %p2525_p4, %p2524_p10 }
 0x161   : > { %p2520_p9 = pneg %p2519_p7 }
 0x163   : > { %p2527_p12 = pnand %p2526_p11, %p2520_p9 }
 0x165   : > { %2530 = shalt.err (!%p2527_p12)
}
 0x166   : > { %2019 = dma.hbm_to_vmem [thread:$0]  (!%p2879_p6), %s3446_s12, 128, %s569_s25, [#allocation21]  }
 0x167   : > { %s2531_s19 = scalar_lea.hbm %s3448_s14, 128 }
 0x168   : > { %p2532_p13 = scmp.ne.s32.totalorder %s3448_s14, %s2531_s19  ;;  %p2538_p3 = scmp.lt.u32.totalorder %s2531_s19, %s3448_s14 }
 0x16a   : > { %p2534_p0 = pnand %p2532_p13, %p2895_p8 }
 0x16c   : > { %p2535_p1 = pneg %p2534_p0 }
 0x16e   : > { %p2540_p2 = pnand %p2538_p3, %p2535_p1 }
 0x170   : > { %2543 = shalt.err (!%p2540_p2)
}
 0x171   : > { %s2544_s24 = scalar_lea.vmem %s591_s22, 128  ;;  %p2552_p10 = scmp.lt.s32.totalorder %s591_s22, %s591_s22 }
 0x172   : > { %p2545_p5 = scmp.ne.s32.totalorder %s591_s22, %s2544_s24  ;;  %p2553_p4 = scmp.lt.s32.totalorder %s2544_s24, %s2544_s24 }
 0x174   : > { %p2547_p7 = pnand %p2545_p5, %p2895_p8  ;;  %p2554_p11 = por %p2553_p4, %p2552_p10 }
 0x176   : > { %p2548_p9 = pneg %p2547_p7 }
 0x178   : > { %p2555_p12 = pnand %p2554_p11, %p2548_p9 }
 0x17a   : > { %2558 = shalt.err (!%p2555_p12)
}
 0x17b   : > { %2025 = dma.hbm_to_vmem [thread:$0]  (!%p2879_p6), %s3448_s14, 128, %s591_s22, [#allocation24]  }
 0x17c   : > { %s2732_s28 = smov [#allocation28]   ;;  %s2559_s19 = scalar_lea.hbm %s3450_s16, 128 }
 0x17d   : > { %s612_s0 = sshll.u32 %s2732_s28, 4  ;;  %p2560_p13 = scmp.ne.s32.totalorder %s3450_s16, %s2559_s19  ;;  %s613_s0 = int_to_ptr.vmem [resolvable:$true] %s612_s0 }
 0x17e   : > { %p2566_p3 = scmp.lt.u32.totalorder %s2559_s19, %s3450_s16 }
 0x17f   : > { %p2562_p0 = pnand %p2560_p13, %p2895_p8 }
 0x181   : > { %p2563_p1 = pneg %p2562_p0 }
 0x183   : > { %p2568_p2 = pnand %p2566_p3, %p2563_p1 }
 0x185   : > { %2571 = shalt.err (!%p2568_p2)
}
 0x186   : > { %s2572_s22 = scalar_lea.vmem %s613_s0, 128  ;;  %p2580_p10 = scmp.lt.s32.totalorder %s613_s0, %s613_s0 }
 0x187   : > { %p2573_p5 = scmp.ne.s32.totalorder %s613_s0, %s2572_s22  ;;  %p2581_p4 = scmp.lt.s32.totalorder %s2572_s22, %s2572_s22 }
 0x189   : > { %p2575_p7 = pnand %p2573_p5, %p2895_p8  ;;  %p2582_p11 = por %p2581_p4, %p2580_p10 }
 0x18b   : > { %p2576_p9 = pneg %p2575_p7 }
 0x18d   : > { %p2583_p12 = pnand %p2582_p11, %p2576_p9 }
 0x18f   : > { %2586 = shalt.err (!%p2583_p12)
}
 0x190   : > { %s3486_s18 = sld [smem:[#allocation43_spill]]  ;;  %s3487_s28 = sld [smem:[#allocation42_spill]] }
 0x191   : > { %s3488_s27 = sld [smem:[#allocation41_spill]]  ;;  %s3489_s1 = sld [smem:[#allocation40_spill]] }
 0x192   : > { %s3490_s17 = sld [smem:[#allocation44_spill]]  ;;  %s3496_s2 = sld [smem:[#allocation46_spill]] }
 0x193   : > { %2031 = dma.hbm_to_vmem [thread:$0]  (!%p2879_p6), %s3450_s16, 128, %s613_s0, [#allocation27]  }
 0x196   : > { %s1752_s19 = sadd.s32 4294967294, %s3486_s18   ;;  %s3199_s21 = sadd.s32 1, %s3486_s18  }
 0x197   : > { %s45_s23 = ssub.s32 %s3486_s18, %s3199_s21  ;;  %s48_s26 = sadd.s32 1, %s3487_s28 }
 0x198   : > { %p46_p8 = scmp.eq.s32.totalorder %s45_s23, 0  ;;  %p55_p13 = scmp.ne.s32.totalorder %s3487_s28, %s3488_s27 }
 0x199   : > { %p56_p0 = scmp.eq.s32.totalorder %s3486_s18, 0  ;;  %p61_p1 = scmp.ne.s32.totalorder %s3488_s27, %s3489_s1 }
 0x19a   : > { %s3210_s29 = scalar_select %p46_p8, %s3487_s28, %s48_s26  }
 0x19b   : > { %p3212_p3 = por %p56_p0, %p55_p13  ;;  %p3492_p2 = scmp.eq.s32.totalorder %s3490_s17, 0 }
 0x19c   : > { %p421_p5 = scmp.eq.s32.totalorder %s3490_s17, 1  ;;  %p427_p7 = scmp.eq.s32.totalorder %s1752_s19, 1 }
 0x19d   : > { %p3218_p6 = por %p3492_p2, %p61_p1  ;;  %p2056_p9 = scmp.lt.s32.totalorder %s3486_s18, 2 }
 0x19e   : > { %s623_s22 = sand.u32 1, %s3487_s28   ;;  %p3225_p10 = por %p421_p5, %p55_p13 }
 0x19f   : > { %p3229_p4 = por %p427_p7, %p61_p1  ;;  %s1771_s27 = sshll.u32 %s623_s22, 3 }
 0x1a0   : > { %s3494_s24 = scalar_select %p3225_p10, 1, 0 }
 0x1a1   : > { %s3495_s25 = scalar_select %p3229_p4, 1, 0 }
 0x1a2   : > { %s1818_s1 = sshll.u32 %s3486_s18, 7  ;;  %s627_s28 = scalar_lea.vmem [#allocation2], %s1771_s27 }
 0x1a3   : > { %s3237_s3 = scalar_lea.hbm %s3496_s2, %s1818_s1  ;;  %s634_s17 = sshll.u32 %s627_s28, 4  ;;  %s3239_s17 = int_to_ptr.vmem [resolvable:$true] %s634_s17 }
 0x1a4   : > { %p3243_p11 = pnand %p2056_p9, %p3212_p3  ;;  %s3247_s18 = scalar_lea.sflag [#allocation3], %s623_s22 }
 0x1a5   : > { %s2587_s23 = scalar_lea.hbm %s3237_s3, 128  ;;  %s2592_s20 = scalar_lea.hbm %s3496_s2, 256 }
 0x1a6   : > { %p2588_p12 = scmp.ne.s32.totalorder %s3237_s3, %s2587_s23  ;;  %p2589_p8 = pneg %p3243_p11 }
 0x1a7   : > { %p2593_p1 = scmp.lt.u32.totalorder %s3237_s3, %s3496_s2  ;;  %p2594_p3 = scmp.lt.u32.totalorder %s2592_s20, %s2587_s23 }
 0x1a8   : > { %p2590_p13 = pnand %p2589_p8, %p2588_p12  ;;  %p2596_p5 = scmp.lt.u32.totalorder %s2587_s23, %s3237_s3 }
 0x1a9   : > { %p2595_p2 = por %p2594_p3, %p2593_p1 }
 0x1aa   : > { %p2591_p0 = pneg %p2590_p13 }
 0x1ab   : > { %p2597_p7 = por %p2596_p5, %p2595_p2 }
 0x1ad   : > { %p2598_p9 = pnand %p2597_p7, %p2591_p0 }
 0x1af   : > { %2601 = shalt.err (!%p2598_p9)
}
 0x1b0   : > { %s2602_s22 = scalar_lea.vmem %s3239_s17, 128  ;;  %s2733_s27 = smov [#allocation2]  }
 0x1b1   : > { %p2603_p12 = scmp.ne.s32.totalorder %s3239_s17, %s2602_s22  ;;  %s2607_s1 = sshll.u32 %s2733_s27, 4  ;;  %s2608_s1 = int_to_ptr.vmem [resolvable:$false] %s2607_s1 }
 0x1b2   : > { %s2609_s26 = scalar_lea.vmem %s2608_s1, 256  ;;  %p2610_p10 = scmp.lt.s32.totalorder %s3239_s17, %s2608_s1 }
 0x1b3   : > { %p2605_p13 = pnand %p2603_p12, %p2589_p8  ;;  %p2611_p1 = scmp.lt.s32.totalorder %s2609_s26, %s2602_s22 }
 0x1b5   : > { %p2606_p4 = pneg %p2605_p13  ;;  %p2612_p3 = por %p2611_p1, %p2610_p10 }
 0x1b7   : > { %p2613_p2 = pnand %p2612_p3, %p2606_p4 }
 0x1b9   : > { %2616 = shalt.err (!%p2613_p2)
}
 0x1ba   : > { %s2734_s23 = smov 64   ;;  %s2735_s20 = smov 4  }
 0x1bb   : > { %2035 = dma.hbm_to_vmem [thread:$0]  (!%p3243_p11), %s3237_s3, 128, %s3239_s17, %s3247_s18, %s2734_s23, %s2734_s23, %s2735_s20  }
 0x1bc   : > { %s3498_s28 = sld [smem:[#allocation45_spill]] }
 0x1c2   : > { %p3499_p8 = scmp.ne.s32.totalorder %s3498_s28, 0 }
 0x1c3   : > { %s3500_s2 = sld [smem:[#allocation41_spill]] (!%p3499_p8) }
 0x1c4   : > { %646 = sbr.rel (%p3499_p8) target bundleno = 2785 (0xae1), region = 88 }
 0x1c9   : > { %s3278_s27 = sand.u32 (!%p3499_p8), 1, %s3500_s2  }
 0x1ca   : > { %s1775_s22 = sshll.u32 (!%p3499_p8), %s3278_s27, 3  ;;  %s649_s1 = scalar_lea.sflag (!%p3499_p8), [#allocation3], %s3278_s27 }
 0x1cb   : > { %s652_s26 = scalar_lea.vmem [#allocation2], %s1775_s22 }
 0x1cc   : > { %2662 = dma.done.wait (%p3218_p6), %s649_s1, 128  }
 0x1cd   : > { %2664 = vsyncadd (%p3218_p6), %s649_s1, 4294967168  ;;  %s3501_s4 = sld [smem:[#allocation44_spill]] }
 0x1d3   : > { %p3502_p10 = scmp.eq.s32.totalorder %s3501_s4, 0 }
 0x1d5   : > { %2666 = dma.done.wait (%p3502_p10), [#allocation6], 256   ;;  %p3503_p4 = pmov %p3502_p10 }
 0x1d7   : > { %2668 = vsyncadd (%p3503_p4), [#allocation6], 4294967040  ;;  %p3504_p11 = pmov %p3503_p4 }
 0x1d8   : > { %p3505_p0 = pmov %p3503_p4 }
 0x1d9   : > { %2670 = dma.done.wait (%p3504_p11), [#allocation9], 256  }
 0x1da   : > { %2672 = vsyncadd (%p3505_p0), [#allocation9], 4294967040  ;;  %p3506_p5 = pmov %p3505_p0 }
 0x1db   : > { %p3507_p7 = pmov %p3505_p0 }
 0x1dc   : > { %2674 = dma.done.wait (%p3506_p5), [#allocation12], 256  }
 0x1dd   : > { %2676 = vsyncadd (%p3507_p7), [#allocation12], 4294967040  ;;  %p3508_p6 = pmov %p3505_p0 }
 0x1de   : > { %p3509_p9 = pmov %p3505_p0 }
 0x1df   : > { %2678 = dma.done.wait (%p3508_p6), [#allocation15], 256  }
 0x1e0   : > { %2680 = vsyncadd (%p3509_p9), [#allocation15], 4294967040  ;;  %p3510_p12 = pmov %p3505_p0 }
 0x1e1   : > { %p3511_p13 = pmov %p3505_p0 }
 0x1e2   : > { %2682 = dma.done.wait (%p3510_p12), [#allocation18], 256  }
 0x1e3   : > { %2684 = vsyncadd (%p3511_p13), [#allocation18], 4294967040  ;;  %p3512_p1 = pmov %p3505_p0 }
 0x1e4   : > { %p3513_p3 = pmov %p3505_p0 }
 0x1e5   : > { %2686 = dma.done.wait (%p3512_p1), [#allocation21], 256  }
 0x1e6   : > { %2688 = vsyncadd (%p3513_p3), [#allocation21], 4294967040  ;;  %p3514_p2 = pmov %p3505_p0 }
 0x1e7   : > { %p3515_p8 = pmov %p3505_p0 }
 0x1e8   : > { %2690 = dma.done.wait (%p3514_p2), [#allocation24], 256  }
 0x1e9   : > { %2692 = vsyncadd (%p3515_p8), [#allocation24], 4294967040  ;;  %p3516_p10 = pmov %p3505_p0 }
 0x1ea   : > { %p3517_p4 = pmov %p3505_p0 }
 0x1eb   : > { %2694 = dma.done.wait (%p3516_p10), [#allocation27], 256  }
 0x1ec   : > { %2696 = vsyncadd (%p3517_p4), [#allocation27], 4294967040  ;;  %v2736_v0 = vmov 0.0   ;;  %v782_v1 = vld [vmem:[%s652_s26] sm:$0xf]  ;;  %s2737_s2 = smov 4   ;;  %v769_v17 = vlaneseq }
 0x1ed   : > { %1853 = vmatprep.subr.mxu0 %v2736_v0  ;;  %1841 = vmatprep.subr.mxu1 %v2736_v0  ;;  %v783_v2 = vld [vmem:[%s652_s26 + $0x4] sm:$0xf]  ;;  %s2738_s3 = smov 24   ;;  %vm2739_vm0 = vmmov 0   ;;  %vm792_vm1 = vcmask 31744   ;;  %v2740_v3 = vmov 0  }
 0x1ee   : > { %785 = vrot.lane.b32.xlu0 %v782_v1, %s2737_s2  ;;  %1843 = vmatprep.mubr.msk.f32.mxu1 %vm2739_vm0, %v2736_v0  ;;  %vm794_vm2 = vcmask 162816   ;;  %vm796_vm3 = vcmask 195584   ;;  %vm798_vm4 = vcmask 326656   ;;  %vm808_vm5 = vcmask 1043456   ;;  %s2741_s0 = smov 1   ;;  %v811_v10 = vld [vmem:[#allocation7] sm:$0xff] }
 0x1ef   : > { %1855 = vmatprep.mubr.msk.f32.mxu0 %vm2739_vm0, %v2736_v0  ;;  %2137 = vset.pattern.permute.xlu1 %v2740_v3  ;;  %v899_v11 = vld [vmem:[#allocation10] sm:$0xff]  ;;  %vm804_vm6 = vcmask 7168   ;;  %v810_v15 = vld [vmem:[#allocation5] sm:$0xff]  ;;  %vm817_vm7 = vcmask 64512   ;;  %v770_v18 = vand.u32 127, %v769_v17  ;;  %v2742_v19 = vmov 0.0|0.0  }
 0x1f0   : > { %2138 = vset.pattern.permute.xlu0 %v2740_v3  ;;  %v980_v20 = vld [vmem:[#allocation11] sm:$0xff]  ;;  %v981_v28 = vld [vmem:[#allocation13] sm:$0xff]  ;;  %vm1795_vm15 = vmneg %vm804_vm6  ;;  %s2744_s17 = smov 2   ;;  %s2745_s19 = smov 104  }
 0x1f1   : > { %vm772_vm8 = vcmp.ge.s32.totalorder %v770_v18, 4  ;;  %vm773_vm9 = vcmp.lt.s32.totalorder %v770_v18, 20  ;;  %vm776_vm10 = vcmp.ge.s32.totalorder %v770_v18, 24  ;;  %vm777_vm11 = vcmp.lt.s32.totalorder %v770_v18, 40  ;;  %v898_v31 = vld [vmem:[#allocation8] sm:$0xff]  ;;  %v1072_v44 = vld [vmem:[#allocation16] sm:$0xff] }
 0x1f2   : > { %789 = vrot.lane.b32.xlu0 %v783_v2, %s2738_s3  ;;  %vm774_vm12 = vmand %vm772_vm8, %vm773_vm9  ;;  %v1159_v45 = vld [vmem:[#allocation19] sm:$0xff]  ;;  %v1248_v46 = vld [vmem:[#allocation22] sm:$0x3f]  ;;  %s2746_s18 = smov 124   ;;  %s1792_s23 = sshll.u32 %s3278_s27, 4 }
 0x1f3   : > { %vm778_vm13 = vmand %vm776_vm10, %vm777_vm11  ;;  %v1338_v47 = vld [vmem:[#allocation25] sm:$0x3f]  ;;  %v1071_v51 = vld [vmem:[#allocation14] sm:$0xff]  ;;  %s766_s20 = scalar_lea.vmem [#allocation29], %s1792_s23  ;;  %s1819_s22 = sshll.u32 %s3501_s4, 8 }
 0x1f4   : > { %vm779_vm14 = vmor %vm774_vm12, %vm778_vm13  ;;  %v1158_v60 = vld [vmem:[#allocation17] sm:$0xff]  ;;  %vm1335_vm12 = vcmask 1045504   ;;  %s1527_s28 = sshll.u32 %s766_s20, 4  ;;  %p3521_p0 = scmp.ne.s32.totalorder %s3494_s24, 0  ;;  %s3385_s28 = int_to_ptr.vmem [resolvable:$true] %s1527_s28 }
 0x1f5   : > { %v3336_v22 = vsel %vm779_vm14, 1.0, %v2736_v0  ;;  %vm1806_vm10 = vmneg %vm792_vm1  ;;  %vm1344_vm14 = vcmask 97280   ;;  %s2747_s4 = smov [#allocation29]  }
 0x260   : > { %v786_v4 = vpop.permute.xlu0 %785 }
 0x261   : > { %v793_v5 = vsel %vm792_vm1, 0.0, %v786_v4 }
 0x262   : > { %v795_v6 = vsel %vm794_vm2, %v793_v5, 0.0  ;;  %vm2743_vm2 = vmmov 1  }
 0x263   : > { %vm1905_vm11 = vmpackc.low %vm2743_vm2, %vm1806_vm10 }
 0x264   : > { %v790_v7 = vpop.permute.xlu0 %789  ;;  %vm1909_vm13 = vmpackc.low %vm808_vm5, %vm2743_vm2 }
 0x265   : > { %v797_v8 = vsel %vm796_vm3, %v795_v6, %v790_v7  ;;  %vm1893_vm3 = vmpackc.low %vm2743_vm2, %vm1795_vm15 }
 0x266   : > { %v799_v9 = vsel %vm798_vm4, %v797_v8, 0.0  ;;  %vm905_vm4 = vcmask 130048   ;;  %v1247_v8 = vld [vmem:[#allocation20] sm:$0x3f] }
 0x267   : > { %801 = vrot.lane.b32.xlu1 %v799_v9, %s2741_s0  ;;  %1854 = vmatpush3.msk.msra.mxu0 %vm808_vm5, %v799_v9  ;;  %v806_v12 = vrot.slane %v799_v9, 4 }
 0x268   : > { %1899 = vmatprep.subr.bf16.mxu0 %v2742_v19  ;;  %1856 = vmatmul.mubr.msk.f32.vlgmr.msra.gmra.mrb[0].mxu0 %vm792_vm1, %v980_v20  ;;  %v1337_v20 = vld [vmem:[#allocation23] sm:$0x3f] }
 0x269   : > { %1869 = vmatprep.mubr.msk.f32.mxu0 %vm2739_vm0, %v2736_v0 }
 0x26b   : > { %814 = vperm.xlu1 %2137, %v811_v10  }
 0x26f   : > { %902 = vperm.xlu1 %2137, %v899_v11  }
 0x2d9   : > { %v802_v13 = vpop.permute.xlu1 %801 }
 0x2da   : > { %v805_v14 = vsel %vm804_vm6, 0.0, %v802_v13  ;;  %vm1069_vm6 = vcmask 15360  }
 0x2db   : > { %v809_v16 = vsel %vm808_vm5, %v805_v14, %v806_v12  ;;  %vm1800_vm8 = vmneg %vm1069_vm6  ;;  %v1421_v14 = vld [vmem:[#allocation28] sm:$0x3f] }
 0x2dc   : > { %1842 = vmatpush3.msra.mxu1 %v809_v16  ;;  %vm3351_vm9 = vmpackc.low %vm2743_vm2, %vm1800_vm8 }
 0x2dd   : > { %1844 = vmatmul.mubr.msk.f32.vlgmr.msra.gmra.mrb[0].mxu1 %vm817_vm7, %v810_v15  ;;  %1891 = vmatprep.subr.bf16.mxu1 %v2742_v19 }
 0x2de   : > { %1850 = vmatprep.mubr.msk.f32.mxu1 %vm2739_vm0, %v2736_v0 }
 0x2ea   : > { %v815_v21 = vpop.permute.xlu1 %814 }
 0x2ee   : > { %v903_v35 = vpop.permute.xlu1 %902 }
 0x33b   : > { %v1058_v32 = vpop.f32.mrb[0].mxu0 }
 0x33c   : > { %v1857_v33 = vpop.f32.mrb[1].mxu0 }
 0x3b0   : > { %v887_v23 = vpop.f32.mrb[0].mxu1 }
 0x3b1   : > { %v888_v24 = vadd.f32 %v887_v23, %v815_v21  ;;  %v1845_v25 = vpop.f32.mrb[1].mxu1  ;;  %v1420_v21 = vld [vmem:[#allocation26] sm:$0x3f] }
 0x3b3   : > { %v891_v26 = vmul.f32 %v3336_v22, %v888_v24 }
 0x3b5   : > { %v892_v27 = vmax.f32 %v891_v26, 0.0 }
 0x3b7   : > { %894 = vrot.lane.b32.xlu0 %v892_v27, %s2741_s0  ;;  %s1514_s0 = scalar_lea.sflag [#allocation4], %s3278_s27 }
 0x3bb   : > { %984 = vperm.xlu0 %2138, %v981_v28  }
 0x429   : > { %v895_v29 = vpop.permute.xlu0 %894 }
 0x42a   : > { %v1892_v30 = vpack.c.bf16 %v892_v27, %v895_v29 }
 0x42c   : > { %1894 = vmatpush3.bf16.msk.msra.mxu1 %vm1893_vm3, %v1892_v30 }
 0x42d   : > { %1895 = vmatprep.subr.bf16.mxu1 %v2742_v19 }
 0x42f   : > { %1851 = vmatmul.mubr.msk.f32.vlgmr.msra.gmra.mrb[2].mxu1 %vm905_vm4, %v898_v31 }
 0x430   : > { %1862 = vmatprep.mubr.msk.f32.mxu1 %vm2739_vm0, %v2736_v0 }
 0x43a   : > { %v985_v34 = vpop.permute.xlu0 %984 }
 0x43b   : > { %v1059_v39 = vadd.f32 %v1058_v32, %v985_v34 }
 0x502   : > { %v975_v36 = vpop.f32.mrb[2].mxu1 }
 0x503   : > { %v976_v37 = vadd.f32 %v975_v36, %v903_v35  ;;  %v1852_v38 = vpop.f32.mrb[3].mxu1 }
 0x505   : > { %v979_v40 = vmax.f32 %v976_v37, 0.0 }
 0x507   : > { %v1062_v41 = vadd.f32 %v1059_v39, %v979_v40 }
 0x509   : > { %v1063_v42 = vmax.f32 %v1062_v41, 0.0 }
 0x50b   : > { %v1064_v43 = vmul.f32 %v3336_v22, %v1063_v42 }
 0x50d   : > { %1066 = vrot.lane.b32.xlu1 %v1064_v43, %s2744_s17 }
 0x511   : > { %1075 = vperm.xlu1 %2137, %v1072_v44  }
 0x515   : > { %1162 = vperm.xlu1 %2137, %v1159_v45  }
 0x519   : > { %1251 = vperm.xlu1 %2137, %v1248_v46  }
 0x51d   : > { %1341 = vperm.xlu1 %2137, %v1338_v47  }
 0x57f   : > { %v1067_v48 = vpop.permute.xlu1 %1066 }
 0x580   : > { %v1896_v50 = vpack.c.bf16 %v1064_v43, %v1067_v48 }
 0x582   : > { %1898 = vmatpush3.bf16.msk.msra.mxu1 %vm3351_vm9, %v1896_v50 }
 0x583   : > { %1903 = vmatprep.subr.bf16.mxu1 %v2742_v19 }
 0x585   : > { %1863 = vmatmul.mubr.msk.f32.vlgmr.msra.gmra.mrb[4].mxu1 %vm905_vm4, %v1071_v51 }
 0x586   : > { %1876 = vmatprep.mubr.msk.f32.mxu1 %vm2739_vm0, %v2736_v0 }
 0x590   : > { %v1076_v52 = vpop.permute.xlu1 %1075 }
 0x594   : > { %v1163_v61 = vpop.permute.xlu1 %1162 }
 0x598   : > { %v1252_v9 = vpop.permute.xlu1 %1251 }
 0x59c   : > { %v1342_v24 = vpop.permute.xlu1 %1341 }
 0x658   : > { %v1147_v53 = vpop.f32.mrb[4].mxu1 }
 0x659   : > { %v1148_v54 = vadd.f32 %v1147_v53, %v1076_v52  ;;  %v1864_v55 = vpop.f32.mrb[5].mxu1 }
 0x65b   : > { %v1151_v56 = vmul.f32 %v3336_v22, %v1148_v54 }
 0x65d   : > { %v1152_v57 = vmax.f32 %v1151_v56, 0.0 }
 0x65f   : > { %1154 = vrot.lane.b32.xlu0 %v1152_v57, %s2744_s17  ;;  %s2617_s17 = scalar_lea.vmem %s3385_s28, 256 }
 0x660   : > { %p2618_p11 = scmp.ne.s32.totalorder %s3385_s28, %s2617_s17 }
 0x662   : > { %p2619_p5 = pnand %p2618_p11, %p3521_p0 }
 0x664   : > { %p2620_p7 = pneg %p2619_p5 }
 0x6d1   : > { %v1155_v58 = vpop.permute.xlu0 %1154 }
 0x6d2   : > { %v1900_v59 = vpack.c.bf16 %v1152_v57, %v1155_v58 }
 0x6d4   : > { %1902 = vmatpush3.bf16.msk.msra.mxu0 %vm3351_vm9, %v1900_v59 }
 0x6d5   : > { %1907 = vmatprep.subr.bf16.mxu0 %v2742_v19 }
 0x6d7   : > { %1870 = vmatmul.mubr.msk.f32.vlgmr.msra.gmra.mrb[2].mxu0 %vm905_vm4, %v1158_v60 }
 0x6d8   : > { %1883 = vmatprep.mubr.msk.f32.mxu0 %vm2739_vm0, %v2736_v0 }
 0x7aa   : > { %v1234_v62 = vpop.f32.mrb[2].mxu0 }
 0x7ab   : > { %v1235_v63 = vadd.f32 %v1234_v62, %v1163_v61  ;;  %v1871_v1 = vpop.f32.mrb[3].mxu0 }
 0x7ad   : > { %v1238_v2 = vmax.f32 %v1235_v63, 0.0 }
 0x7af   : > { %v1239_v3 = vadd.f32 %v1238_v2, %v1064_v43 }
 0x7b1   : > { %v1240_v4 = vmax.f32 %v1239_v3, 0.0 }
 0x7b3   : > { %v1241_v5 = vmul.f32 %v3336_v22, %v1240_v4 }
 0x7b5   : > { %1243 = vrot.lane.b32.xlu0 %v1241_v5, %s2737_s2 }
 0x827   : > { %v1244_v6 = vpop.permute.xlu0 %1243 }
 0x828   : > { %v1904_v7 = vpack.c.bf16 %v1241_v5, %v1244_v6 }
 0x82a   : > { %1906 = vmatpush3.bf16.msk.msra.mxu1 %vm1905_vm11, %v1904_v7 }
 0x82d   : > { %1877 = vmatmul.mubr.msk.f32.vlgmr.msra.gmra.mrb[6].mxu1 %vm905_vm4, %v1247_v8 }
 0x900   : > { %v1323_v10 = vpop.f32.mrb[6].mxu1 }
 0x901   : > { %v1324_v11 = vadd.f32 %v1323_v10, %v1252_v9  ;;  %v1878_v12 = vpop.f32.mrb[7].mxu1 }
 0x903   : > { %v1327_v13 = vmul.f32 %v3336_v22, %v1324_v11 }
 0x905   : > { %1329 = vrot.lane.b32.xlu0 %v1327_v13, %s2737_s2  ;;  %v1333_v15 = vrot.slane %v1327_v13, 2  ;;  %s3520_s2 = sld [smem:[#allocation51_spill]] }
 0x909   : > { %1424 = vperm.xlu0 %2138, %v1421_v14  }
 0x90b   : > { %s3390_s3 = scalar_lea.hbm %s3520_s2, %s1819_s22 }
 0x977   : > { %v1330_v16 = vpop.permute.xlu0 %1329 }
 0x978   : > { %v1332_v17 = vsel %vm792_vm1, 0.0, %v1330_v16 }
 0x979   : > { %v1336_v18 = vsel %vm1335_vm12, %v1332_v17, %v1333_v15 }
 0x97a   : > { %v1908_v19 = vpack.c.bf16 %v1333_v15, %v1336_v18 }
 0x97c   : > { %1910 = vmatpush3.bf16.msk.msra.mxu0 %vm1909_vm13, %v1908_v19 }
 0x97d   : > { %1886 = vmatprep.subr.mxu0 %v2736_v0 }
 0x97f   : > { %1884 = vmatmul.mubr.msk.f32.vlgmr.msra.gmra.mrb[4].mxu0 %vm1344_vm14, %v1337_v20 }
 0x980   : > { %1887 = vmatpush3.msra.mxu0 %v1241_v5  ;;  %1888 = vmatprep.mubr.msk.f32.mxu0 %vm2739_vm0, %v2736_v0  ;;  %vm1506_vm0 = vcmask 128000  }
 0x987   : > { %1889 = vmatmul.mubr.msk.f32.vlgmr.msra.gmra.mrb[4].mxu0 %vm817_vm7, %v1420_v21 }
 0x988   : > { %v1425_v23 = vpop.permute.xlu0 %1424 }
 0x989   : > { %v1911_v25 = vadd.f32 %v1425_v23, %v1342_v24 }
 0xa5a   : > { %v1496_v26 = vpop.f32.mrb[4].mxu0 }
 0xa5b   : > { %v1912_v27 = vadd.f32 %v1911_v25, %v1496_v26  ;;  %v1890_v28 = vpop.f32.mrb[5].mxu0 }
 0xa5d   : > { %v1501_v29 = vmul.f32 %v1912_v27, %v3336_v22 }
 0xa5f   : > { %1508 = vrot.lane.b32.xlu0 %v1501_v29, %s2745_s19  ;;  %1503 = vrot.lane.b32.xlu1 %v1501_v29, %s2746_s18  ;;  %s2621_s19 = sshll.u32 %s2747_s4, 4  ;;  %s2622_s19 = int_to_ptr.vmem [resolvable:$false] %s2621_s19 }
 0xa60   : > { %s2623_s18 = scalar_lea.vmem %s2622_s19, 512  ;;  %p2624_p6 = scmp.lt.s32.totalorder %s3385_s28, %s2622_s19 }
 0xa61   : > { %p2625_p9 = scmp.lt.s32.totalorder %s2623_s18, %s2617_s17 }
 0xa63   : > { %p2626_p12 = por %p2625_p9, %p2624_p6 }
 0xa65   : > { %p2627_p13 = pnand %p2626_p12, %p2620_p7 }
 0xad1   : > { %v1509_v0 = vpop.permute.xlu0 %1508  ;;  %v1504_v22 = vpop.permute.xlu1 %1503 }
 0xad2   : > { %1812 = vst.msk [vmem:[%s766_s20 + $0x8] sm:$0x3f] %vm1506_vm0, %v1509_v0  ;;  %1507 = vst.msk [vmem:[%s766_s20] sm:$0x3f] %vm1506_vm0, %v1504_v22 }
 0xad3   : > { %2630 = shalt.err (!%p2627_p13)
}
 0xad4   : > { %s2631_s23 = scalar_lea.hbm %s3390_s3, 256  ;;  %s2635_s1 = scalar_lea.hbm %s3520_s2, 512 }
 0xad5   : > { %p2632_p1 = scmp.ne.s32.totalorder %s3390_s3, %s2631_s23  ;;  %p2636_p8 = scmp.lt.u32.totalorder %s3390_s3, %s3520_s2 }
 0xad6   : > { %p2637_p10 = scmp.lt.u32.totalorder %s2635_s1, %s2631_s23  ;;  %p2639_p11 = scmp.lt.u32.totalorder %s2631_s23, %s3390_s3 }
 0xad7   : > { %p2633_p3 = pnand %p2632_p1, %p3521_p0 }
 0xad8   : > { %p2638_p4 = por %p2637_p10, %p2636_p8 }
 0xad9   : > { %p2634_p2 = pneg %p2633_p3 }
 0xada   : > { %p2640_p5 = por %p2639_p11, %p2638_p4 }
 0xadc   : > { %p2641_p7 = pnand %p2640_p5, %p2634_p2 }
 0xade   : > { %2644 = shalt.err (!%p2641_p7)
}
 0xadf   : > { %s2748_s17 = smov 128   ;;  %s2749_s19 = smov 8  }
 0xae0   : > { %1981 = dma.vmem_to_hbm [thread:$0]  (%p3521_p0), %s3385_s28, 256, %s3390_s3, %s1514_s0, %s2748_s17, %s2748_s17, %s2749_s19  }
 0xae1 PF: > { %s3522_s18 = sld [smem:[#allocation40_spill]]  ;;  %s3523_s20 = sld [smem:[#allocation43_spill]] }
 0xae2   : > { %p3524_p6 = scmp.ne.s32.totalorder %s3495_s25, 0 }
 0xae7   : > { %s1542_s22 = sand.u32 1, %s3522_s18   ;;  %p3525_p9 = scmp.ge.s32.totalorder %s3523_s20, 2 }
 0xae8   : > { %s1543_s23 = scalar_lea.sflag [#allocation4], %s1542_s22 }
 0xae9   : > { %p2037_p12 = pnand %p3525_p9, %p3524_p6 }
 0xaeb   : > { %2698 = dma.done.wait (!%p2037_p12), %s1543_s23, 256  }
 0xaec   : > { %2700 = vsyncadd (!%p2037_p12), %s1543_s23, 4294967040  ;;  %s3526_s24 = sld [smem:[#allocation41_spill]]  ;;  %s3527_s25 = sld [smem:[#allocation42_spill]] }
 0xaed   : > { %p38_p13 = scmp.ge.s32.totalorder %s3199_s21, 4   ;;  %s3528_s26 = smov %s3210_s29 }
 0xaee   : > { %s3529_s27 = smov %s3199_s21 }
 0xaef   :  { %40 = sbr.rel (!%p38_p13) target bundleno = 20 (0x14), region = 198 }
 0xaf6   :  { %1548 = vsyncpa [#allocation3], 1 }
 0xaf7   :  { %1550 = vsyncpa [#allocation3 + $0x1], 1 }
 0xaf8   :  { %1551 = vsyncpa [#allocation6], 1 }
 0xaf9   :  { %1552 = vsyncpa [#allocation9], 1 }
 0xafa   :  { %1553 = vsyncpa [#allocation12], 1 }
 0xafb   :  { %1554 = vsyncpa [#allocation15], 1 }
 0xafc   :  { %1555 = vsyncpa [#allocation18], 1 }
 0xafd   :  { %1556 = vsyncpa [#allocation21], 1 }
 0xafe   :  { %1557 = vsyncpa [#allocation24], 1 }
 0xaff   :  { %1558 = vsyncpa [#allocation27], 1 }
 0xb00   :  { %1559 = vsyncpa [#allocation4], 1 }
 0xb01   :  { %1561 = vsyncpa [#allocation4 + $0x1], 1 }

</bundles_post_ra>
